<compile_context>
chip_gen: v6e
topology: v6e:2x2x1
jax: 0.10.0
libtpu: 0.0.40
codegen_flags: <defaults>
</compile_context>

<pallas_src>
import functools

import jax
import jax.numpy as jnp
from jax import lax
from jax.experimental import pallas as pl
from jax.experimental.pallas import tpu as pltpu


# ----------------------------------------------------------------------------
# Pallas kernel: fused tile-local projection + pairwise tanh scoring
#                + dependency feature + mask penalty, lane-dense (C, S) output
# ----------------------------------------------------------------------------
def gold_dep_kernel(xp_ref, xa_ref, w_prd_ref, b_prd_ref, w_arg_ref, b_arg_ref,
                    w_blkT_ref, w_dep_ref, deps_ref, pen_ref, o_ref):
    # xp_ref    : (TI, H)     bf16  predicate-token rows of this block
    # xa_ref    : (S,  H)     bf16  all argument-token rows of this batch item
    # w_prd_ref : (H, C*H)    bf16  l_prd weight, columns replicated per case
    # b_prd_ref : (1, C*H)    f32   l_prd bias, replicated per case
    # w_arg_ref : (H, C*H)    bf16  l_arg weight (case-major columns)
    # b_arg_ref : (1, C*H)    f32   l_arg bias
    # w_blkT_ref: (C, C*H)    bf16  block-diagonal tanh-part "outs" weights (transposed)
    # w_dep_ref : (C, 1)      f32   per-case weight of the dep feature (column H of outs[c])
    # deps_ref  : (TI, S)     f32   symmetrized dependency flags for this prd block
    # pen_ref   : (TI, C, S)  f32   additive (~mask) * -1024 penalty (output layout)
    # o_ref     : (TI, C, S)  f32   logits block of output[b, i0:i0+TI, :, :]
    TI = xp_ref.shape[0]

    # Tile-local projections: bf16 operands on the MXU, f32 accumulation.
    h_p = jnp.dot(xp_ref[...], w_prd_ref[...],
                  preferred_element_type=jnp.float32) + b_prd_ref[...]       # (TI, C*H)
    h_a = jnp.dot(xa_ref[...], w_arg_ref[...],
                  preferred_element_type=jnp.float32) + b_arg_ref[...]       # (S, C*H)

    w_blkT = w_blkT_ref[...]                                                 # (C, C*H) bf16
    w_dep = w_dep_ref[...]                                                   # (C, 1)   f32

    # Unrolled loop over the TI predicates of this block.  Every step uses only
    # plain 2-D patterns: sublane-broadcast add + f32 EUP tanh (v5e-safe; on
    # v6e/v7x the tanh could be bf16 for ~2x EUP throughput -- TODO(synk)),
    # bf16 cast, one MXU dot_general contracting the lane (C*H) axis of BOTH
    # operands so the result lands as (C, S) with S on lanes, then a fused
    # rank-1 dependency feature + mask penalty and a lane-dense store.
    # Never materializes the full (TI, S, C*H) tanh slab.
    for i in range(TI):
        t_i = jnp.tanh(h_p[i:i + 1, :] + h_a).astype(jnp.bfloat16)           # (S, C*H)
        red_i = lax.dot_general(w_blkT, t_i, (((1,), (1,)), ((), ())),
                                preferred_element_type=jnp.float32)          # (C, S)
        dep_i = w_dep * deps_ref[i:i + 1, :]                                 # (C,1)*(1,S) -> (C,S)
        o_ref[i] = red_i + dep_i + pen_ref[i]


def pas_scores(x_bf16, deps_sym, pen, fp, *, tile_i):
    """Scoring head: grid over (batch, predicate-block); output is (B,S,C,S)."""
    B, S, H = x_bf16.shape
    C = fp["num_case"]
    CH = C * H
    assert S % tile_i == 0
    n_i = S // tile_i
    grid = (B, n_i)

    cost = pl.CostEstimate(
        flops=int(2 * B * n_i * (tile_i + S) * H * CH          # projections
                  + 2 * B * S * S * C * CH),                   # block-diag reduce
        transcendentals=int(B * S * S * CH),                   # tanh count
        bytes_accessed=int(
            x_bf16.size * 2 * (1 + n_i)
            + deps_sym.size * 4 + pen.size * 4 + B * S * C * S * 4
            + (fp["w_prd_rep"].size + fp["w_arg_bf16"].size + fp["w_blkT"].size) * 2
            + (fp["b_prd_rep"].size + fp["b_arg_2d"].size + fp["w_dep"].size) * 4))

    grid_spec = pltpu.PrefetchScalarGridSpec(
        num_scalar_prefetch=0,
        grid=grid,
        in_specs=[
            # x, predicate rows of this block
            pl.BlockSpec((None, tile_i, H), lambda b, ib: (b, ib, 0)),
            # x, all argument rows of this batch item
            pl.BlockSpec((None, S, H), lambda b, ib: (b, 0, 0)),
            # weights: constant index maps -> stay VMEM-resident across steps
            pl.BlockSpec((H, CH), lambda b, ib: (0, 0)),        # w_prd_rep
            pl.BlockSpec((1, CH), lambda b, ib: (0, 0)),        # b_prd_rep
            pl.BlockSpec((H, CH), lambda b, ib: (0, 0)),        # w_arg
            pl.BlockSpec((1, CH), lambda b, ib: (0, 0)),        # b_arg
            pl.BlockSpec((C, CH), lambda b, ib: (0, 0)),        # w_blkT
            pl.BlockSpec((C, 1), lambda b, ib: (0, 0)),         # w_dep
            # lane-dense deps row tile and penalty (already output layout)
            pl.BlockSpec((None, tile_i, S), lambda b, ib: (b, ib, 0)),
            pl.BlockSpec((None, tile_i, C, S), lambda b, ib: (b, ib, 0, 0)),
        ],
        out_specs=pl.BlockSpec((None, tile_i, C, S), lambda b, ib: (b, ib, 0, 0)),
    )

    return pl.pallas_call(
        gold_dep_kernel,
        grid_spec=grid_spec,
        out_shape=jax.ShapeDtypeStruct((B, S, C, S), jnp.float32),
        compiler_params=pltpu.CompilerParams(
            dimension_semantics=("parallel", "parallel"),
            vmem_limit_bytes=32 * 1024 * 1024,
        ),
        cost_estimate=cost,
    )(x_bf16, x_bf16, fp["w_prd_rep"], fp["b_prd_rep"], fp["w_arg_bf16"],
      fp["b_arg_2d"], fp["w_blkT"], fp["w_dep"], deps_sym, pen)


# ----------------------------------------------------------------------------
# Glue (plain JAX): encoder stand-in, mask, loss
# ----------------------------------------------------------------------------
def get_mask(attention_mask, ng_token_mask):
    # TODO(synk): exact get_mask() helper not provided; standard combination:
    # an argument position is valid iff it is not "ng" and it is attended.
    return ng_token_mask & (attention_mask[:, None, None, :] > 0)


def cross_entropy_pas_loss(output, target):
    # TODO(synk): exact cross_entropy_pas_loss helper not provided; standard
    # masked cross entropy over the argument axis (dim=3).
    log_sm = jax.nn.log_softmax(output, axis=3)
    return jnp.sum(-log_sm * target) / (jnp.sum(target) + 1e-6)


def encode_sequence(params, input_ids, segment_ids):
    # TODO(synk): pretrained BertModel encoder cannot be reproduced here; replaced
    # by a deterministic token + position + segment embedding stand-in.
    B, S = input_ids.shape
    tok = params["tok_emb"][input_ids]                    # (B, S, H)
    pos = params["pos_emb"][None, :S, :]                  # (1, S, H)
    seg = params["seg_emb"][segment_ids]                  # (B, S, H)
    return tok + pos + seg


def gold_dep_forward(params, input_ids, attention_mask, segment_ids,
                     ng_token_mask, target, deps, *, tile_i):
    # Encoder (stand-in).  nn.Dropout == identity in eval mode.
    seq_out = encode_sequence(params, input_ids, segment_ids)                # (B, S, H)
    x_bf16 = seq_out.astype(jnp.bfloat16)

    # Mask penalty, already in the kernel's / PyTorch's (B, S, C, S) layout:
    # no transposes on either side of the kernel.
    mask = get_mask(attention_mask, ng_token_mask)                           # (B, S, C, S) bool
    pen = jnp.where(mask, 0.0, -1024.0).astype(jnp.float32)

    # deps | deps.T  (undirected dependency information).
    deps_sym = (deps | deps.swapaxes(1, 2)).astype(jnp.float32)              # (B, S, S)

    output = pas_scores(x_bf16, deps_sym, pen, params, tile_i=tile_i)        # (B, S, C, S)
    loss = cross_entropy_pas_loss(output, target)
    return loss, output


# ----------------------------------------------------------------------------
# Parameters (PyTorch-faithful layout) + one-time fusion for the kernel
# ----------------------------------------------------------------------------
def make_params(key, vocab_size, max_seq, hidden, num_case):
    ks = jax.random.split(key, 8)
    sc = 0.02
    return {
        "num_case": num_case,  # already includes +coreference
        "tok_emb": sc * jax.random.normal(ks[0], (vocab_size, hidden), jnp.float32),
        "pos_emb": sc * jax.random.normal(ks[1], (max_seq, hidden), jnp.float32),
        "seg_emb": sc * jax.random.normal(ks[2], (2, hidden), jnp.float32),
        # l_prd: Linear(H, H); l_arg: Linear(H, C*H)  (stored as (in, out))
        "w_prd": sc * jax.random.normal(ks[3], (hidden, hidden), jnp.float32),
        "b_prd": sc * jax.random.normal(ks[6], (hidden,), jnp.float32),
        "w_arg": sc * jax.random.normal(ks[4], (hidden, hidden * num_case), jnp.float32),
        "b_arg": sc * jax.random.normal(ks[7], (hidden * num_case,), jnp.float32),
        # outs[c]: Linear(H+1, 1, bias=False) -> stacked weight (C, H+1)
        "w_out": sc * jax.random.normal(ks[5], (num_case, hidden + 1), jnp.float32),
    }


def fuse_params(p):
    """One-time (outside the jit hot path) weight fusion for the kernel."""
    C = p["num_case"]
    H = p["w_prd"].shape[0]
    f = dict(p)
    # Case replication of the l_prd projection baked into the weight columns:
    # column c*H+h == w_prd[:, h], so the kernel never concatenates h_p.
    f["w_prd_rep"] = jnp.tile(p["w_prd"], (1, C)).astype(jnp.bfloat16)       # (H, C*H)
    f["b_prd_rep"] = jnp.tile(p["b_prd"], C).reshape(1, C * H)               # (1, C*H) f32
    f["w_arg_bf16"] = p["w_arg"].astype(jnp.bfloat16)                        # (H, C*H)
    f["b_arg_2d"] = p["b_arg"].reshape(1, C * H)                             # (1, C*H) f32
    # Transposed block-diagonal tanh-part "outs" weights: (C, C*H), bf16 for MXU.
    w_out_h = p["w_out"][:, :H]                                              # (C, H)
    f["w_blkT"] = (jnp.eye(C, dtype=jnp.float32)[:, :, None]
                   * w_out_h[:, None, :]).reshape(C, C * H).astype(jnp.bfloat16)
    # Per-case weight of the concatenated dep feature (column H of each head).
    f["w_dep"] = p["w_out"][:, H].reshape(C, 1).astype(jnp.float32)
    return f


# ----------------------------------------------------------------------------
# Main
# ----------------------------------------------------------------------------
if __name__ == "__main__":
    B, S, H, V = 2, 32, 32, 100
    num_case, coreference = 3, True
    C = num_case + int(coreference)          # 4  -> C*H = 128 (lane-dense tanh/reduce)
    TILE_I = 16                              # 2 predicate blocks per batch item

    key = jax.random.PRNGKey(0)
    k_in, k_ng, k_tg, k_drop, k_dep, k_par = jax.random.split(key, 6)

    input_ids = jax.random.randint(k_in, (B, S), 0, V, dtype=jnp.int32)
    lengths = jnp.array([S, S - 5], jnp.int32)
    attention_mask = (jnp.arange(S)[None, :] < lengths[:, None]).astype(jnp.int32)
    segment_ids = jnp.zeros((B, S), jnp.int32)

    ng_token_mask = jax.random.bernoulli(k_ng, 0.8, (B, S, C, S))
    # guarantee at least one allowed argument per (b, prd, case)
    ng_token_mask = ng_token_mask | (jnp.arange(S) == 0)[None, None, None, :]

    tgt_idx = jax.random.randint(k_tg, (B, S, C), 0, S)
    target = jax.nn.one_hot(tgt_idx, S, dtype=jnp.float32)
    target = target * jax.random.bernoulli(k_drop, 0.5, (B, S, C, 1)).astype(jnp.float32)

    deps = jax.random.bernoulli(k_dep, 0.25, (B, S, S))                      # gold dependency arcs

    params = fuse_params(make_params(k_par, V, S, H, C))

    fwd = jax.jit(functools.partial(gold_dep_forward, params, tile_i=TILE_I))
    loss, output = fwd(input_ids, attention_mask, segment_ids, ng_token_mask, target, deps)
    jax.block_until_ready((loss, output))

    assert output.shape == (B, S, C, S)
    assert bool(jnp.isfinite(loss))
    assert bool(jnp.all(jnp.isfinite(output)))
    print("KERNEL_OK")
</pallas_src>

<mosaic_0001>
module attributes {stable_mosaic.version = 11 : i64} {
  func.func @gold_dep_kernel(%arg0: i32, %arg1: i32, %arg2: memref<1x16x32xbf16, #tpu.memory_space<vmem>>, %arg3: memref<1x32x32xbf16, #tpu.memory_space<vmem>>, %arg4: memref<32x128xbf16, #tpu.memory_space<vmem>>, %arg5: memref<1x128xf32, #tpu.memory_space<vmem>>, %arg6: memref<32x128xbf16, #tpu.memory_space<vmem>>, %arg7: memref<1x128xf32, #tpu.memory_space<vmem>>, %arg8: memref<4x128xbf16, #tpu.memory_space<vmem>>, %arg9: memref<4x1xf32, #tpu.memory_space<vmem>>, %arg10: memref<1x16x32xf32, #tpu.memory_space<vmem>>, %arg11: memref<1x16x4x32xf32, #tpu.memory_space<vmem>>, %arg12: memref<1x16x4x32xf32, #tpu.memory_space<vmem>>) attributes {dimension_semantics = [#tpu.dimension_semantics<parallel>, #tpu.dimension_semantics<parallel>], iteration_bounds = array<i64: 2, 2>, scalar_prefetch = 0 : i64, scratch_operands = 0 : i64, tpu.core_type = #tpu.core_type<tc>, window_params = [{transform_indices = @transform_0, window_bounds = array<i64: 1, 16, 32>}, {transform_indices = @transform_1, window_bounds = array<i64: 1, 32, 32>}, {pipeline_mode = #tpu.pipeline_mode<synchronous>, transform_indices = @transform_2, window_bounds = array<i64: 32, 128>}, {pipeline_mode = #tpu.pipeline_mode<synchronous>, transform_indices = @transform_3, window_bounds = array<i64: 1, 128>}, {pipeline_mode = #tpu.pipeline_mode<synchronous>, transform_indices = @transform_4, window_bounds = array<i64: 32, 128>}, {pipeline_mode = #tpu.pipeline_mode<synchronous>, transform_indices = @transform_5, window_bounds = array<i64: 1, 128>}, {pipeline_mode = #tpu.pipeline_mode<synchronous>, transform_indices = @transform_6, window_bounds = array<i64: 4, 128>}, {pipeline_mode = #tpu.pipeline_mode<synchronous>, transform_indices = @transform_7, window_bounds = array<i64: 4, 1>}, {transform_indices = @transform_8, window_bounds = array<i64: 1, 16, 32>}, {transform_indices = @transform_9, window_bounds = array<i64: 1, 16, 4, 32>}, {transform_indices = @transform_10, window_bounds = array<i64: 1, 16, 4, 32>}]} {
    %c0 = arith.constant 0 : index
    %c0_0 = arith.constant 0 : index
    %c0_1 = arith.constant 0 : index
    %0 = vector.load %arg2[%c0, %c0_0, %c0_1] : memref<1x16x32xbf16, #tpu.memory_space<vmem>>, vector<1x16x32xbf16>
    %1 = vector.shape_cast %0 : vector<1x16x32xbf16> to vector<16x32xbf16>
    %c0_2 = arith.constant 0 : index
    %c0_3 = arith.constant 0 : index
    %2 = vector.load %arg4[%c0_2, %c0_3] : memref<32x128xbf16, #tpu.memory_space<vmem>>, vector<32x128xbf16>
    %cst = arith.constant dense<0.000000e+00> : vector<16x128xf32>
    %3 = tpu.matmul %1, %2, %cst {dimension_numbers = #tpu.dot_dimension_numbers<[1], [0], [0], [1], [0, 0, 1, 1], [], []>} : vector<16x32xbf16>, vector<32x128xbf16>, vector<16x128xf32> -> vector<16x128xf32>
    %c0_4 = arith.constant 0 : index
    %c0_5 = arith.constant 0 : index
    %4 = vector.load %arg5[%c0_4, %c0_5] : memref<1x128xf32, #tpu.memory_space<vmem>>, vector<1x128xf32>
    %5 = vector.broadcast %4 : vector<1x128xf32> to vector<16x128xf32>
    %6 = arith.addf %3, %5 : vector<16x128xf32>
    %c0_6 = arith.constant 0 : index
    %c0_7 = arith.constant 0 : index
    %c0_8 = arith.constant 0 : index
    %7 = vector.load %arg3[%c0_6, %c0_7, %c0_8] : memref<1x32x32xbf16, #tpu.memory_space<vmem>>, vector<1x32x32xbf16>
    %8 = vector.shape_cast %7 : vector<1x32x32xbf16> to vector<32x32xbf16>
    %c0_9 = arith.constant 0 : index
    %c0_10 = arith.constant 0 : index
    %9 = vector.load %arg6[%c0_9, %c0_10] : memref<32x128xbf16, #tpu.memory_space<vmem>>, vector<32x128xbf16>
    %cst_11 = arith.constant dense<0.000000e+00> : vector<32x128xf32>
    %10 = tpu.matmul %8, %9, %cst_11 {dimension_numbers = #tpu.dot_dimension_numbers<[1], [0], [0], [1], [0, 0, 1, 1], [], []>} : vector<32x32xbf16>, vector<32x128xbf16>, vector<32x128xf32> -> vector<32x128xf32>
    %c0_12 = arith.constant 0 : index
    %c0_13 = arith.constant 0 : index
    %11 = vector.load %arg7[%c0_12, %c0_13] : memref<1x128xf32, #tpu.memory_space<vmem>>, vector<1x128xf32>
    %12 = vector.broadcast %11 : vector<1x128xf32> to vector<32x128xf32>
    %13 = arith.addf %10, %12 : vector<32x128xf32>
    %c0_14 = arith.constant 0 : index
    %c0_15 = arith.constant 0 : index
    %14 = vector.load %arg8[%c0_14, %c0_15] : memref<4x128xbf16, #tpu.memory_space<vmem>>, vector<4x128xbf16>
    %c0_16 = arith.constant 0 : index
    %c0_17 = arith.constant 0 : index
    %15 = vector.load %arg9[%c0_16, %c0_17] : memref<4x1xf32, #tpu.memory_space<vmem>>, vector<4x1xf32>
    %16 = vector.extract_strided_slice %6 {offsets = [0, 0], sizes = [1, 128], strides = [1, 1]} : vector<16x128xf32> to vector<1x128xf32>
    %17 = vector.broadcast %16 : vector<1x128xf32> to vector<32x128xf32>
    %18 = arith.addf %17, %13 : vector<32x128xf32>
    %19 = math.tanh %18 : vector<32x128xf32>
    %20 = arith.truncf %19 : vector<32x128xf32> to vector<32x128xbf16>
    %cst_18 = arith.constant dense<0.000000e+00> : vector<4x32xf32>
    %21 = tpu.matmul %14, %20, %cst_18 {dimension_numbers = #tpu.dot_dimension_numbers<[1], [1], [0], [0], [0, 0, 1, 0], [], []>} : vector<4x128xbf16>, vector<32x128xbf16>, vector<4x32xf32> -> vector<4x32xf32>
    %c0_19 = arith.constant 0 : index
    %c0_20 = arith.constant 0 : index
    %c0_21 = arith.constant 0 : index
    %22 = vector.load %arg10[%c0_19, %c0_20, %c0_21] : memref<1x16x32xf32, #tpu.memory_space<vmem>>, vector<1x1x32xf32>
    %23 = vector.shape_cast %22 : vector<1x1x32xf32> to vector<1x32xf32>
    %24 = vector.broadcast %15 : vector<4x1xf32> to vector<4x32xf32>
    %25 = vector.broadcast %23 : vector<1x32xf32> to vector<4x32xf32>
    %26 = arith.mulf %24, %25 : vector<4x32xf32>
    %27 = arith.addf %21, %26 : vector<4x32xf32>
    %c0_22 = arith.constant 0 : index
    %c0_23 = arith.constant 0 : index
    %c0_24 = arith.constant 0 : index
    %c0_25 = arith.constant 0 : index
    %28 = vector.load %arg11[%c0_22, %c0_23, %c0_24, %c0_25] : memref<1x16x4x32xf32, #tpu.memory_space<vmem>>, vector<1x1x4x32xf32>
    %29 = vector.shape_cast %28 : vector<1x1x4x32xf32> to vector<4x32xf32>
    %30 = arith.addf %27, %29 : vector<4x32xf32>
    %c0_26 = arith.constant 0 : index
    %c0_27 = arith.constant 0 : index
    %c0_28 = arith.constant 0 : index
    %c0_29 = arith.constant 0 : index
    %31 = vector.load %arg12[%c0_26, %c0_27, %c0_28, %c0_29] : memref<1x16x4x32xf32, #tpu.memory_space<vmem>>, vector<1x1x4x32xf32>
    %32 = vector.shape_cast %31 : vector<1x1x4x32xf32> to vector<4x32xf32>
    %33 = vector.shape_cast %30 : vector<4x32xf32> to vector<1x1x4x32xf32>
    tpu.vector_store %arg12[%c0_26, %c0_27, %c0_28, %c0_29], %33 {strides = array<i32>} : memref<1x16x4x32xf32, #tpu.memory_space<vmem>>, vector<1x1x4x32xf32>,
    %34 = vector.extract_strided_slice %6 {offsets = [1, 0], sizes = [1, 128], strides = [1, 1]} : vector<16x128xf32> to vector<1x128xf32>
    %35 = vector.broadcast %34 : vector<1x128xf32> to vector<32x128xf32>
    %36 = arith.addf %35, %13 : vector<32x128xf32>
    %37 = math.tanh %36 : vector<32x128xf32>
    %38 = arith.truncf %37 : vector<32x128xf32> to vector<32x128xbf16>
    %cst_30 = arith.constant dense<0.000000e+00> : vector<4x32xf32>
    %39 = tpu.matmul %14, %38, %cst_30 {dimension_numbers = #tpu.dot_dimension_numbers<[1], [1], [0], [0], [0, 0, 1, 0], [], []>} : vector<4x128xbf16>, vector<32x128xbf16>, vector<4x32xf32> -> vector<4x32xf32>
    %c0_31 = arith.constant 0 : index
    %c1 = arith.constant 1 : index
    %c0_32 = arith.constant 0 : index
    %40 = vector.load %arg10[%c0_31, %c1, %c0_32] : memref<1x16x32xf32, #tpu.memory_space<vmem>>, vector<1x1x32xf32>
    %41 = vector.shape_cast %40 : vector<1x1x32xf32> to vector<1x32xf32>
    %42 = vector.broadcast %15 : vector<4x1xf32> to vector<4x32xf32>
    %43 = vector.broadcast %41 : vector<1x32xf32> to vector<4x32xf32>
    %44 = arith.mulf %42, %43 : vector<4x32xf32>
    %45 = arith.addf %39, %44 : vector<4x32xf32>
    %c0_33 = arith.constant 0 : index
    %c1_34 = arith.constant 1 : index
    %c0_35 = arith.constant 0 : index
    %c0_36 = arith.constant 0 : index
    %46 = vector.load %arg11[%c0_33, %c1_34, %c0_35, %c0_36] : memref<1x16x4x32xf32, #tpu.memory_space<vmem>>, vector<1x1x4x32xf32>
    %47 = vector.shape_cast %46 : vector<1x1x4x32xf32> to vector<4x32xf32>
    %48 = arith.addf %45, %47 : vector<4x32xf32>
    %c0_37 = arith.constant 0 : index
    %c1_38 = arith.constant 1 : index
    %c0_39 = arith.constant 0 : index
    %c0_40 = arith.constant 0 : index
    %49 = vector.load %arg12[%c0_37, %c1_38, %c0_39, %c0_40] : memref<1x16x4x32xf32, #tpu.memory_space<vmem>>, vector<1x1x4x32xf32>
    %50 = vector.shape_cast %49 : vector<1x1x4x32xf32> to vector<4x32xf32>
    %51 = vector.shape_cast %48 : vector<4x32xf32> to vector<1x1x4x32xf32>
    tpu.vector_store %arg12[%c0_37, %c1_38, %c0_39, %c0_40], %51 {strides = array<i32>} : memref<1x16x4x32xf32, #tpu.memory_space<vmem>>, vector<1x1x4x32xf32>,
    %52 = vector.extract_strided_slice %6 {offsets = [2, 0], sizes = [1, 128], strides = [1, 1]} : vector<16x128xf32> to vector<1x128xf32>
    %53 = vector.broadcast %52 : vector<1x128xf32> to vector<32x128xf32>
    %54 = arith.addf %53, %13 : vector<32x128xf32>
    %55 = math.tanh %54 : vector<32x128xf32>
    %56 = arith.truncf %55 : vector<32x128xf32> to vector<32x128xbf16>
    %cst_41 = arith.constant dense<0.000000e+00> : vector<4x32xf32>
    %57 = tpu.matmul %14, %56, %cst_41 {dimension_numbers = #tpu.dot_dimension_numbers<[1], [1], [0], [0], [0, 0, 1, 0], [], []>} : vector<4x128xbf16>, vector<32x128xbf16>, vector<4x32xf32> -> vector<4x32xf32>
    %c0_42 = arith.constant 0 : index
    %c2 = arith.constant 2 : index
    %c0_43 = arith.constant 0 : index
    %58 = vector.load %arg10[%c0_42, %c2, %c0_43] : memref<1x16x32xf32, #tpu.memory_space<vmem>>, vector<1x1x32xf32>
    %59 = vector.shape_cast %58 : vector<1x1x32xf32> to vector<1x32xf32>
    %60 = vector.broadcast %15 : vector<4x1xf32> to vector<4x32xf32>
    %61 = vector.broadcast %59 : vector<1x32xf32> to vector<4x32xf32>
    %62 = arith.mulf %60, %61 : vector<4x32xf32>
    %63 = arith.addf %57, %62 : vector<4x32xf32>
    %c0_44 = arith.constant 0 : index
    %c2_45 = arith.constant 2 : index
    %c0_46 = arith.constant 0 : index
    %c0_47 = arith.constant 0 : index
    %64 = vector.load %arg11[%c0_44, %c2_45, %c0_46, %c0_47] : memref<1x16x4x32xf32, #tpu.memory_space<vmem>>, vector<1x1x4x32xf32>
    %65 = vector.shape_cast %64 : vector<1x1x4x32xf32> to vector<4x32xf32>
    %66 = arith.addf %63, %65 : vector<4x32xf32>
    %c0_48 = arith.constant 0 : index
    %c2_49 = arith.constant 2 : index
    %c0_50 = arith.constant 0 : index
    %c0_51 = arith.constant 0 : index
    %67 = vector.load %arg12[%c0_48, %c2_49, %c0_50, %c0_51] : memref<1x16x4x32xf32, #tpu.memory_space<vmem>>, vector<1x1x4x32xf32>
    %68 = vector.shape_cast %67 : vector<1x1x4x32xf32> to vector<4x32xf32>
    %69 = vector.shape_cast %66 : vector<4x32xf32> to vector<1x1x4x32xf32>
    tpu.vector_store %arg12[%c0_48, %c2_49, %c0_50, %c0_51], %69 {strides = array<i32>} : memref<1x16x4x32xf32, #tpu.memory_space<vmem>>, vector<1x1x4x32xf32>,
    %70 = vector.extract_strided_slice %6 {offsets = [3, 0], sizes = [1, 128], strides = [1, 1]} : vector<16x128xf32> to vector<1x128xf32>
    %71 = vector.broadcast %70 : vector<1x128xf32> to vector<32x128xf32>
    %72 = arith.addf %71, %13 : vector<32x128xf32>
    %73 = math.tanh %72 : vector<32x128xf32>
    %74 = arith.truncf %73 : vector<32x128xf32> to vector<32x128xbf16>
    %cst_52 = arith.constant dense<0.000000e+00> : vector<4x32xf32>
    %75 = tpu.matmul %14, %74, %cst_52 {dimension_numbers = #tpu.dot_dimension_numbers<[1], [1], [0], [0], [0, 0, 1, 0], [], []>} : vector<4x128xbf16>, vector<32x128xbf16>, vector<4x32xf32> -> vector<4x32xf32>
    %c0_53 = arith.constant 0 : index
    %c3 = arith.constant 3 : index
    %c0_54 = arith.constant 0 : index
    %76 = vector.load %arg10[%c0_53, %c3, %c0_54] : memref<1x16x32xf32, #tpu.memory_space<vmem>>, vector<1x1x32xf32>
    %77 = vector.shape_cast %76 : vector<1x1x32xf32> to vector<1x32xf32>
    %78 = vector.broadcast %15 : vector<4x1xf32> to vector<4x32xf32>
    %79 = vector.broadcast %77 : vector<1x32xf32> to vector<4x32xf32>
    %80 = arith.mulf %78, %79 : vector<4x32xf32>
    %81 = arith.addf %75, %80 : vector<4x32xf32>
    %c0_55 = arith.constant 0 : index
    %c3_56 = arith.constant 3 : index
    %c0_57 = arith.constant 0 : index
    %c0_58 = arith.constant 0 : index
    %82 = vector.load %arg11[%c0_55, %c3_56, %c0_57, %c0_58] : memref<1x16x4x32xf32, #tpu.memory_space<vmem>>, vector<1x1x4x32xf32>
    %83 = vector.shape_cast %82 : vector<1x1x4x32xf32> to vector<4x32xf32>
    %84 = arith.addf %81, %83 : vector<4x32xf32>
    %c0_59 = arith.constant 0 : index
    %c3_60 = arith.constant 3 : index
    %c0_61 = arith.constant 0 : index
    %c0_62 = arith.constant 0 : index
    %85 = vector.load %arg12[%c0_59, %c3_60, %c0_61, %c0_62] : memref<1x16x4x32xf32, #tpu.memory_space<vmem>>, vector<1x1x4x32xf32>
    %86 = vector.shape_cast %85 : vector<1x1x4x32xf32> to vector<4x32xf32>
    %87 = vector.shape_cast %84 : vector<4x32xf32> to vector<1x1x4x32xf32>
    tpu.vector_store %arg12[%c0_59, %c3_60, %c0_61, %c0_62], %87 {strides = array<i32>} : memref<1x16x4x32xf32, #tpu.memory_space<vmem>>, vector<1x1x4x32xf32>,
    %88 = vector.extract_strided_slice %6 {offsets = [4, 0], sizes = [1, 128], strides = [1, 1]} : vector<16x128xf32> to vector<1x128xf32>
    %89 = vector.broadcast %88 : vector<1x128xf32> to vector<32x128xf32>
    %90 = arith.addf %89, %13 : vector<32x128xf32>
    %91 = math.tanh %90 : vector<32x128xf32>
    %92 = arith.truncf %91 : vector<32x128xf32> to vector<32x128xbf16>
    %cst_63 = arith.constant dense<0.000000e+00> : vector<4x32xf32>
    %93 = tpu.matmul %14, %92, %cst_63 {dimension_numbers = #tpu.dot_dimension_numbers<[1], [1], [0], [0], [0, 0, 1, 0], [], []>} : vector<4x128xbf16>, vector<32x128xbf16>, vector<4x32xf32> -> vector<4x32xf32>
    %c0_64 = arith.constant 0 : index
    %c4 = arith.constant 4 : index
    %c0_65 = arith.constant 0 : index
    %94 = vector.load %arg10[%c0_64, %c4, %c0_65] : memref<1x16x32xf32, #tpu.memory_space<vmem>>, vector<1x1x32xf32>
    %95 = vector.shape_cast %94 : vector<1x1x32xf32> to vector<1x32xf32>
    %96 = vector.broadcast %15 : vector<4x1xf32> to vector<4x32xf32>
    %97 = vector.broadcast %95 : vector<1x32xf32> to vector<4x32xf32>
    %98 = arith.mulf %96, %97 : vector<4x32xf32>
    %99 = arith.addf %93, %98 : vector<4x32xf32>
    %c0_66 = arith.constant 0 : index
    %c4_67 = arith.constant 4 : index
    %c0_68 = arith.constant 0 : index
    %c0_69 = arith.constant 0 : index
    %100 = vector.load %arg11[%c0_66, %c4_67, %c0_68, %c0_69] : memref<1x16x4x32xf32, #tpu.memory_space<vmem>>, vector<1x1x4x32xf32>
    %101 = vector.shape_cast %100 : vector<1x1x4x32xf32> to vector<4x32xf32>
    %102 = arith.addf %99, %101 : vector<4x32xf32>
    %c0_70 = arith.constant 0 : index
    %c4_71 = arith.constant 4 : index
    %c0_72 = arith.constant 0 : index
    %c0_73 = arith.constant 0 : index
    %103 = vector.load %arg12[%c0_70, %c4_71, %c0_72, %c0_73] : memref<1x16x4x32xf32, #tpu.memory_space<vmem>>, vector<1x1x4x32xf32>
    %104 = vector.shape_cast %103 : vector<1x1x4x32xf32> to vector<4x32xf32>
    %105 = vector.shape_cast %102 : vector<4x32xf32> to vector<1x1x4x32xf32>
    tpu.vector_store %arg12[%c0_70, %c4_71, %c0_72, %c0_73], %105 {strides = array<i32>} : memref<1x16x4x32xf32, #tpu.memory_space<vmem>>, vector<1x1x4x32xf32>,
    %106 = vector.extract_strided_slice %6 {offsets = [5, 0], sizes = [1, 128], strides = [1, 1]} : vector<16x128xf32> to vector<1x128xf32>
    %107 = vector.broadcast %106 : vector<1x128xf32> to vector<32x128xf32>
    %108 = arith.addf %107, %13 : vector<32x128xf32>
    %109 = math.tanh %108 : vector<32x128xf32>
    %110 = arith.truncf %109 : vector<32x128xf32> to vector<32x128xbf16>
    %cst_74 = arith.constant dense<0.000000e+00> : vector<4x32xf32>
    %111 = tpu.matmul %14, %110, %cst_74 {dimension_numbers = #tpu.dot_dimension_numbers<[1], [1], [0], [0], [0, 0, 1, 0], [], []>} : vector<4x128xbf16>, vector<32x128xbf16>, vector<4x32xf32> -> vector<4x32xf32>
    %c0_75 = arith.constant 0 : index
    %c5 = arith.constant 5 : index
    %c0_76 = arith.constant 0 : index
    %112 = vector.load %arg10[%c0_75, %c5, %c0_76] : memref<1x16x32xf32, #tpu.memory_space<vmem>>, vector<1x1x32xf32>
    %113 = vector.shape_cast %112 : vector<1x1x32xf32> to vector<1x32xf32>
    %114 = vector.broadcast %15 : vector<4x1xf32> to vector<4x32xf32>
    %115 = vector.broadcast %113 : vector<1x32xf32> to vector<4x32xf32>
    %116 = arith.mulf %114, %115 : vector<4x32xf32>
    %117 = arith.addf %111, %116 : vector<4x32xf32>
    %c0_77 = arith.constant 0 : index
    %c5_78 = arith.constant 5 : index
    %c0_79 = arith.constant 0 : index
    %c0_80 = arith.constant 0 : index
    %118 = vector.load %arg11[%c0_77, %c5_78, %c0_79, %c0_80] : memref<1x16x4x32xf32, #tpu.memory_space<vmem>>, vector<1x1x4x32xf32>
    %119 = vector.shape_cast %118 : vector<1x1x4x32xf32> to vector<4x32xf32>
    %120 = arith.addf %117, %119 : vector<4x32xf32>
    %c0_81 = arith.constant 0 : index
    %c5_82 = arith.constant 5 : index
    %c0_83 = arith.constant 0 : index
    %c0_84 = arith.constant 0 : index
    %121 = vector.load %arg12[%c0_81, %c5_82, %c0_83, %c0_84] : memref<1x16x4x32xf32, #tpu.memory_space<vmem>>, vector<1x1x4x32xf32>
    %122 = vector.shape_cast %121 : vector<1x1x4x32xf32> to vector<4x32xf32>
    %123 = vector.shape_cast %120 : vector<4x32xf32> to vector<1x1x4x32xf32>
    tpu.vector_store %arg12[%c0_81, %c5_82, %c0_83, %c0_84], %123 {strides = array<i32>} : memref<1x16x4x32xf32, #tpu.memory_space<vmem>>, vector<1x1x4x32xf32>,
    %124 = vector.extract_strided_slice %6 {offsets = [6, 0], sizes = [1, 128], strides = [1, 1]} : vector<16x128xf32> to vector<1x128xf32>
    %125 = vector.broadcast %124 : vector<1x128xf32> to vector<32x128xf32>
    %126 = arith.addf %125, %13 : vector<32x128xf32>
    %127 = math.tanh %126 : vector<32x128xf32>
    %128 = arith.truncf %127 : vector<32x128xf32> to vector<32x128xbf16>
    %cst_85 = arith.constant dense<0.000000e+00> : vector<4x32xf32>
    %129 = tpu.matmul %14, %128, %cst_85 {dimension_numbers = #tpu.dot_dimension_numbers<[1], [1], [0], [0], [0, 0, 1, 0], [], []>} : vector<4x128xbf16>, vector<32x128xbf16>, vector<4x32xf32> -> vector<4x32xf32>
    %c0_86 = arith.constant 0 : index
    %c6 = arith.constant 6 : index
    %c0_87 = arith.constant 0 : index
    %130 = vector.load %arg10[%c0_86, %c6, %c0_87] : memref<1x16x32xf32, #tpu.memory_space<vmem>>, vector<1x1x32xf32>
    %131 = vector.shape_cast %130 : vector<1x1x32xf32> to vector<1x32xf32>
    %132 = vector.broadcast %15 : vector<4x1xf32> to vector<4x32xf32>
    %133 = vector.broadcast %131 : vector<1x32xf32> to vector<4x32xf32>
    %134 = arith.mulf %132, %133 : vector<4x32xf32>
    %135 = arith.addf %129, %134 : vector<4x32xf32>
    %c0_88 = arith.constant 0 : index
    %c6_89 = arith.constant 6 : index
    %c0_90 = arith.constant 0 : index
    %c0_91 = arith.constant 0 : index
    %136 = vector.load %arg11[%c0_88, %c6_89, %c0_90, %c0_91] : memref<1x16x4x32xf32, #tpu.memory_space<vmem>>, vector<1x1x4x32xf32>
    %137 = vector.shape_cast %136 : vector<1x1x4x32xf32> to vector<4x32xf32>
    %138 = arith.addf %135, %137 : vector<4x32xf32>
    %c0_92 = arith.constant 0 : index
    %c6_93 = arith.constant 6 : index
    %c0_94 = arith.constant 0 : index
    %c0_95 = arith.constant 0 : index
    %139 = vector.load %arg12[%c0_92, %c6_93, %c0_94, %c0_95] : memref<1x16x4x32xf32, #tpu.memory_space<vmem>>, vector<1x1x4x32xf32>
    %140 = vector.shape_cast %139 : vector<1x1x4x32xf32> to vector<4x32xf32>
    %141 = vector.shape_cast %138 : vector<4x32xf32> to vector<1x1x4x32xf32>
    tpu.vector_store %arg12[%c0_92, %c6_93, %c0_94, %c0_95], %141 {strides = array<i32>} : memref<1x16x4x32xf32, #tpu.memory_space<vmem>>, vector<1x1x4x32xf32>,
    %142 = vector.extract_strided_slice %6 {offsets = [7, 0], sizes = [1, 128], strides = [1, 1]} : vector<16x128xf32> to vector<1x128xf32>
    %143 = vector.broadcast %142 : vector<1x128xf32> to vector<32x128xf32>
    %144 = arith.addf %143, %13 : vector<32x128xf32>
    %145 = math.tanh %144 : vector<32x128xf32>
    %146 = arith.truncf %145 : vector<32x128xf32> to vector<32x128xbf16>
    %cst_96 = arith.constant dense<0.000000e+00> : vector<4x32xf32>
    %147 = tpu.matmul %14, %146, %cst_96 {dimension_numbers = #tpu.dot_dimension_numbers<[1], [1], [0], [0], [0, 0, 1, 0], [], []>} : vector<4x128xbf16>, vector<32x128xbf16>, vector<4x32xf32> -> vector<4x32xf32>
    %c0_97 = arith.constant 0 : index
    %c7 = arith.constant 7 : index
    %c0_98 = arith.constant 0 : index
    %148 = vector.load %arg10[%c0_97, %c7, %c0_98] : memref<1x16x32xf32, #tpu.memory_space<vmem>>, vector<1x1x32xf32>
    %149 = vector.shape_cast %148 : vector<1x1x32xf32> to vector<1x32xf32>
    %150 = vector.broadcast %15 : vector<4x1xf32> to vector<4x32xf32>
    %151 = vector.broadcast %149 : vector<1x32xf32> to vector<4x32xf32>
    %152 = arith.mulf %150, %151 : vector<4x32xf32>
    %153 = arith.addf %147, %152 : vector<4x32xf32>
    %c0_99 = arith.constant 0 : index
    %c7_100 = arith.constant 7 : index
    %c0_101 = arith.constant 0 : index
    %c0_102 = arith.constant 0 : index
    %154 = vector.load %arg11[%c0_99, %c7_100, %c0_101, %c0_102] : memref<1x16x4x32xf32, #tpu.memory_space<vmem>>, vector<1x1x4x32xf32>
    %155 = vector.shape_cast %154 : vector<1x1x4x32xf32> to vector<4x32xf32>
    %156 = arith.addf %153, %155 : vector<4x32xf32>
    %c0_103 = arith.constant 0 : index
    %c7_104 = arith.constant 7 : index
    %c0_105 = arith.constant 0 : index
    %c0_106 = arith.constant 0 : index
    %157 = vector.load %arg12[%c0_103, %c7_104, %c0_105, %c0_106] : memref<1x16x4x32xf32, #tpu.memory_space<vmem>>, vector<1x1x4x32xf32>
    %158 = vector.shape_cast %157 : vector<1x1x4x32xf32> to vector<4x32xf32>
    %159 = vector.shape_cast %156 : vector<4x32xf32> to vector<1x1x4x32xf32>
    tpu.vector_store %arg12[%c0_103, %c7_104, %c0_105, %c0_106], %159 {strides = array<i32>} : memref<1x16x4x32xf32, #tpu.memory_space<vmem>>, vector<1x1x4x32xf32>,
    %160 = vector.extract_strided_slice %6 {offsets = [8, 0], sizes = [1, 128], strides = [1, 1]} : vector<16x128xf32> to vector<1x128xf32>
    %161 = vector.broadcast %160 : vector<1x128xf32> to vector<32x128xf32>
    %162 = arith.addf %161, %13 : vector<32x128xf32>
    %163 = math.tanh %162 : vector<32x128xf32>
    %164 = arith.truncf %163 : vector<32x128xf32> to vector<32x128xbf16>
    %cst_107 = arith.constant dense<0.000000e+00> : vector<4x32xf32>
    %165 = tpu.matmul %14, %164, %cst_107 {dimension_numbers = #tpu.dot_dimension_numbers<[1], [1], [0], [0], [0, 0, 1, 0], [], []>} : vector<4x128xbf16>, vector<32x128xbf16>, vector<4x32xf32> -> vector<4x32xf32>
    %c0_108 = arith.constant 0 : index
    %c8 = arith.constant 8 : index
    %c0_109 = arith.constant 0 : index
    %166 = vector.load %arg10[%c0_108, %c8, %c0_109] : memref<1x16x32xf32, #tpu.memory_space<vmem>>, vector<1x1x32xf32>
    %167 = vector.shape_cast %166 : vector<1x1x32xf32> to vector<1x32xf32>
    %168 = vector.broadcast %15 : vector<4x1xf32> to vector<4x32xf32>
    %169 = vector.broadcast %167 : vector<1x32xf32> to vector<4x32xf32>
    %170 = arith.mulf %168, %169 : vector<4x32xf32>
    %171 = arith.addf %165, %170 : vector<4x32xf32>
    %c0_110 = arith.constant 0 : index
    %c8_111 = arith.constant 8 : index
    %c0_112 = arith.constant 0 : index
    %c0_113 = arith.constant 0 : index
    %172 = vector.load %arg11[%c0_110, %c8_111, %c0_112, %c0_113] : memref<1x16x4x32xf32, #tpu.memory_space<vmem>>, vector<1x1x4x32xf32>
    %173 = vector.shape_cast %172 : vector<1x1x4x32xf32> to vector<4x32xf32>
    %174 = arith.addf %171, %173 : vector<4x32xf32>
    %c0_114 = arith.constant 0 : index
    %c8_115 = arith.constant 8 : index
    %c0_116 = arith.constant 0 : index
    %c0_117 = arith.constant 0 : index
    %175 = vector.load %arg12[%c0_114, %c8_115, %c0_116, %c0_117] : memref<1x16x4x32xf32, #tpu.memory_space<vmem>>, vector<1x1x4x32xf32>
    %176 = vector.shape_cast %175 : vector<1x1x4x32xf32> to vector<4x32xf32>
    %177 = vector.shape_cast %174 : vector<4x32xf32> to vector<1x1x4x32xf32>
    tpu.vector_store %arg12[%c0_114, %c8_115, %c0_116, %c0_117], %177 {strides = array<i32>} : memref<1x16x4x32xf32, #tpu.memory_space<vmem>>, vector<1x1x4x32xf32>,
    %178 = vector.extract_strided_slice %6 {offsets = [9, 0], sizes = [1, 128], strides = [1, 1]} : vector<16x128xf32> to vector<1x128xf32>
    %179 = vector.broadcast %178 : vector<1x128xf32> to vector<32x128xf32>
    %180 = arith.addf %179, %13 : vector<32x128xf32>
    %181 = math.tanh %180 : vector<32x128xf32>
    %182 = arith.truncf %181 : vector<32x128xf32> to vector<32x128xbf16>
    %cst_118 = arith.constant dense<0.000000e+00> : vector<4x32xf32>
    %183 = tpu.matmul %14, %182, %cst_118 {dimension_numbers = #tpu.dot_dimension_numbers<[1], [1], [0], [0], [0, 0, 1, 0], [], []>} : vector<4x128xbf16>, vector<32x128xbf16>, vector<4x32xf32> -> vector<4x32xf32>
    %c0_119 = arith.constant 0 : index
    %c9 = arith.constant 9 : index
    %c0_120 = arith.constant 0 : index
    %184 = vector.load %arg10[%c0_119, %c9, %c0_120] : memref<1x16x32xf32, #tpu.memory_space<vmem>>, vector<1x1x32xf32>
    %185 = vector.shape_cast %184 : vector<1x1x32xf32> to vector<1x32xf32>
    %186 = vector.broadcast %15 : vector<4x1xf32> to vector<4x32xf32>
    %187 = vector.broadcast %185 : vector<1x32xf32> to vector<4x32xf32>
    %188 = arith.mulf %186, %187 : vector<4x32xf32>
    %189 = arith.addf %183, %188 : vector<4x32xf32>
    %c0_121 = arith.constant 0 : index
    %c9_122 = arith.constant 9 : index
    %c0_123 = arith.constant 0 : index
    %c0_124 = arith.constant 0 : index
    %190 = vector.load %arg11[%c0_121, %c9_122, %c0_123, %c0_124] : memref<1x16x4x32xf32, #tpu.memory_space<vmem>>, vector<1x1x4x32xf32>
    %191 = vector.shape_cast %190 : vector<1x1x4x32xf32> to vector<4x32xf32>
    %192 = arith.addf %189, %191 : vector<4x32xf32>
    %c0_125 = arith.constant 0 : index
    %c9_126 = arith.constant 9 : index
    %c0_127 = arith.constant 0 : index
    %c0_128 = arith.constant 0 : index
    %193 = vector.load %arg12[%c0_125, %c9_126, %c0_127, %c0_128] : memref<1x16x4x32xf32, #tpu.memory_space<vmem>>, vector<1x1x4x32xf32>
    %194 = vector.shape_cast %193 : vector<1x1x4x32xf32> to vector<4x32xf32>
    %195 = vector.shape_cast %192 : vector<4x32xf32> to vector<1x1x4x32xf32>
    tpu.vector_store %arg12[%c0_125, %c9_126, %c0_127, %c0_128], %195 {strides = array<i32>} : memref<1x16x4x32xf32, #tpu.memory_space<vmem>>, vector<1x1x4x32xf32>,
    %196 = vector.extract_strided_slice %6 {offsets = [10, 0], sizes = [1, 128], strides = [1, 1]} : vector<16x128xf32> to vector<1x128xf32>
    %197 = vector.broadcast %196 : vector<1x128xf32> to vector<32x128xf32>
    %198 = arith.addf %197, %13 : vector<32x128xf32>
    %199 = math.tanh %198 : vector<32x128xf32>
    %200 = arith.truncf %199 : vector<32x128xf32> to vector<32x128xbf16>
    %cst_129 = arith.constant dense<0.000000e+00> : vector<4x32xf32>
    %201 = tpu.matmul %14, %200, %cst_129 {dimension_numbers = #tpu.dot_dimension_numbers<[1], [1], [0], [0], [0, 0, 1, 0], [], []>} : vector<4x128xbf16>, vector<32x128xbf16>, vector<4x32xf32> -> vector<4x32xf32>
    %c0_130 = arith.constant 0 : index
    %c10 = arith.constant 10 : index
    %c0_131 = arith.constant 0 : index
    %202 = vector.load %arg10[%c0_130, %c10, %c0_131] : memref<1x16x32xf32, #tpu.memory_space<vmem>>, vector<1x1x32xf32>
    %203 = vector.shape_cast %202 : vector<1x1x32xf32> to vector<1x32xf32>
    %204 = vector.broadcast %15 : vector<4x1xf32> to vector<4x32xf32>
    %205 = vector.broadcast %203 : vector<1x32xf32> to vector<4x32xf32>
    %206 = arith.mulf %204, %205 : vector<4x32xf32>
    %207 = arith.addf %201, %206 : vector<4x32xf32>
    %c0_132 = arith.constant 0 : index
    %c10_133 = arith.constant 10 : index
    %c0_134 = arith.constant 0 : index
    %c0_135 = arith.constant 0 : index
    %208 = vector.load %arg11[%c0_132, %c10_133, %c0_134, %c0_135] : memref<1x16x4x32xf32, #tpu.memory_space<vmem>>, vector<1x1x4x32xf32>
    %209 = vector.shape_cast %208 : vector<1x1x4x32xf32> to vector<4x32xf32>
    %210 = arith.addf %207, %209 : vector<4x32xf32>
    %c0_136 = arith.constant 0 : index
    %c10_137 = arith.constant 10 : index
    %c0_138 = arith.constant 0 : index
    %c0_139 = arith.constant 0 : index
    %211 = vector.load %arg12[%c0_136, %c10_137, %c0_138, %c0_139] : memref<1x16x4x32xf32, #tpu.memory_space<vmem>>, vector<1x1x4x32xf32>
    %212 = vector.shape_cast %211 : vector<1x1x4x32xf32> to vector<4x32xf32>
    %213 = vector.shape_cast %210 : vector<4x32xf32> to vector<1x1x4x32xf32>
    tpu.vector_store %arg12[%c0_136, %c10_137, %c0_138, %c0_139], %213 {strides = array<i32>} : memref<1x16x4x32xf32, #tpu.memory_space<vmem>>, vector<1x1x4x32xf32>,
    %214 = vector.extract_strided_slice %6 {offsets = [11, 0], sizes = [1, 128], strides = [1, 1]} : vector<16x128xf32> to vector<1x128xf32>
    %215 = vector.broadcast %214 : vector<1x128xf32> to vector<32x128xf32>
    %216 = arith.addf %215, %13 : vector<32x128xf32>
    %217 = math.tanh %216 : vector<32x128xf32>
    %218 = arith.truncf %217 : vector<32x128xf32> to vector<32x128xbf16>
    %cst_140 = arith.constant dense<0.000000e+00> : vector<4x32xf32>
    %219 = tpu.matmul %14, %218, %cst_140 {dimension_numbers = #tpu.dot_dimension_numbers<[1], [1], [0], [0], [0, 0, 1, 0], [], []>} : vector<4x128xbf16>, vector<32x128xbf16>, vector<4x32xf32> -> vector<4x32xf32>
    %c0_141 = arith.constant 0 : index
    %c11 = arith.constant 11 : index
    %c0_142 = arith.constant 0 : index
    %220 = vector.load %arg10[%c0_141, %c11, %c0_142] : memref<1x16x32xf32, #tpu.memory_space<vmem>>, vector<1x1x32xf32>
    %221 = vector.shape_cast %220 : vector<1x1x32xf32> to vector<1x32xf32>
    %222 = vector.broadcast %15 : vector<4x1xf32> to vector<4x32xf32>
    %223 = vector.broadcast %221 : vector<1x32xf32> to vector<4x32xf32>
    %224 = arith.mulf %222, %223 : vector<4x32xf32>
    %225 = arith.addf %219, %224 : vector<4x32xf32>
    %c0_143 = arith.constant 0 : index
    %c11_144 = arith.constant 11 : index
    %c0_145 = arith.constant 0 : index
    %c0_146 = arith.constant 0 : index
    %226 = vector.load %arg11[%c0_143, %c11_144, %c0_145, %c0_146] : memref<1x16x4x32xf32, #tpu.memory_space<vmem>>, vector<1x1x4x32xf32>
    %227 = vector.shape_cast %226 : vector<1x1x4x32xf32> to vector<4x32xf32>
    %228 = arith.addf %225, %227 : vector<4x32xf32>
    %c0_147 = arith.constant 0 : index
    %c11_148 = arith.constant 11 : index
    %c0_149 = arith.constant 0 : index
    %c0_150 = arith.constant 0 : index
    %229 = vector.load %arg12[%c0_147, %c11_148, %c0_149, %c0_150] : memref<1x16x4x32xf32, #tpu.memory_space<vmem>>, vector<1x1x4x32xf32>
    %230 = vector.shape_cast %229 : vector<1x1x4x32xf32> to vector<4x32xf32>
    %231 = vector.shape_cast %228 : vector<4x32xf32> to vector<1x1x4x32xf32>
    tpu.vector_store %arg12[%c0_147, %c11_148, %c0_149, %c0_150], %231 {strides = array<i32>} : memref<1x16x4x32xf32, #tpu.memory_space<vmem>>, vector<1x1x4x32xf32>,
    %232 = vector.extract_strided_slice %6 {offsets = [12, 0], sizes = [1, 128], strides = [1, 1]} : vector<16x128xf32> to vector<1x128xf32>
    %233 = vector.broadcast %232 : vector<1x128xf32> to vector<32x128xf32>
    %234 = arith.addf %233, %13 : vector<32x128xf32>
    %235 = math.tanh %234 : vector<32x128xf32>
    %236 = arith.truncf %235 : vector<32x128xf32> to vector<32x128xbf16>
    %cst_151 = arith.constant dense<0.000000e+00> : vector<4x32xf32>
    %237 = tpu.matmul %14, %236, %cst_151 {dimension_numbers = #tpu.dot_dimension_numbers<[1], [1], [0], [0], [0, 0, 1, 0], [], []>} : vector<4x128xbf16>, vector<32x128xbf16>, vector<4x32xf32> -> vector<4x32xf32>
    %c0_152 = arith.constant 0 : index
    %c12 = arith.constant 12 : index
    %c0_153 = arith.constant 0 : index
    %238 = vector.load %arg10[%c0_152, %c12, %c0_153] : memref<1x16x32xf32, #tpu.memory_space<vmem>>, vector<1x1x32xf32>
    %239 = vector.shape_cast %238 : vector<1x1x32xf32> to vector<1x32xf32>
    %240 = vector.broadcast %15 : vector<4x1xf32> to vector<4x32xf32>
    %241 = vector.broadcast %239 : vector<1x32xf32> to vector<4x32xf32>
    %242 = arith.mulf %240, %241 : vector<4x32xf32>
    %243 = arith.addf %237, %242 : vector<4x32xf32>
    %c0_154 = arith.constant 0 : index
    %c12_155 = arith.constant 12 : index
    %c0_156 = arith.constant 0 : index
    %c0_157 = arith.constant 0 : index
    %244 = vector.load %arg11[%c0_154, %c12_155, %c0_156, %c0_157] : memref<1x16x4x32xf32, #tpu.memory_space<vmem>>, vector<1x1x4x32xf32>
    %245 = vector.shape_cast %244 : vector<1x1x4x32xf32> to vector<4x32xf32>
    %246 = arith.addf %243, %245 : vector<4x32xf32>
    %c0_158 = arith.constant 0 : index
    %c12_159 = arith.constant 12 : index
    %c0_160 = arith.constant 0 : index
    %c0_161 = arith.constant 0 : index
    %247 = vector.load %arg12[%c0_158, %c12_159, %c0_160, %c0_161] : memref<1x16x4x32xf32, #tpu.memory_space<vmem>>, vector<1x1x4x32xf32>
    %248 = vector.shape_cast %247 : vector<1x1x4x32xf32> to vector<4x32xf32>
    %249 = vector.shape_cast %246 : vector<4x32xf32> to vector<1x1x4x32xf32>
    tpu.vector_store %arg12[%c0_158, %c12_159, %c0_160, %c0_161], %249 {strides = array<i32>} : memref<1x16x4x32xf32, #tpu.memory_space<vmem>>, vector<1x1x4x32xf32>,
    %250 = vector.extract_strided_slice %6 {offsets = [13, 0], sizes = [1, 128], strides = [1, 1]} : vector<16x128xf32> to vector<1x128xf32>
    %251 = vector.broadcast %250 : vector<1x128xf32> to vector<32x128xf32>
    %252 = arith.addf %251, %13 : vector<32x128xf32>
    %253 = math.tanh %252 : vector<32x128xf32>
    %254 = arith.truncf %253 : vector<32x128xf32> to vector<32x128xbf16>
    %cst_162 = arith.constant dense<0.000000e+00> : vector<4x32xf32>
    %255 = tpu.matmul %14, %254, %cst_162 {dimension_numbers = #tpu.dot_dimension_numbers<[1], [1], [0], [0], [0, 0, 1, 0], [], []>} : vector<4x128xbf16>, vector<32x128xbf16>, vector<4x32xf32> -> vector<4x32xf32>
    %c0_163 = arith.constant 0 : index
    %c13 = arith.constant 13 : index
    %c0_164 = arith.constant 0 : index
    %256 = vector.load %arg10[%c0_163, %c13, %c0_164] : memref<1x16x32xf32, #tpu.memory_space<vmem>>, vector<1x1x32xf32>
    %257 = vector.shape_cast %256 : vector<1x1x32xf32> to vector<1x32xf32>
    %258 = vector.broadcast %15 : vector<4x1xf32> to vector<4x32xf32>
    %259 = vector.broadcast %257 : vector<1x32xf32> to vector<4x32xf32>
    %260 = arith.mulf %258, %259 : vector<4x32xf32>
    %261 = arith.addf %255, %260 : vector<4x32xf32>
    %c0_165 = arith.constant 0 : index
    %c13_166 = arith.constant 13 : index
    %c0_167 = arith.constant 0 : index
    %c0_168 = arith.constant 0 : index
    %262 = vector.load %arg11[%c0_165, %c13_166, %c0_167, %c0_168] : memref<1x16x4x32xf32, #tpu.memory_space<vmem>>, vector<1x1x4x32xf32>
    %263 = vector.shape_cast %262 : vector<1x1x4x32xf32> to vector<4x32xf32>
    %264 = arith.addf %261, %263 : vector<4x32xf32>
    %c0_169 = arith.constant 0 : index
    %c13_170 = arith.constant 13 : index
    %c0_171 = arith.constant 0 : index
    %c0_172 = arith.constant 0 : index
    %265 = vector.load %arg12[%c0_169, %c13_170, %c0_171, %c0_172] : memref<1x16x4x32xf32, #tpu.memory_space<vmem>>, vector<1x1x4x32xf32>
    %266 = vector.shape_cast %265 : vector<1x1x4x32xf32> to vector<4x32xf32>
    %267 = vector.shape_cast %264 : vector<4x32xf32> to vector<1x1x4x32xf32>
    tpu.vector_store %arg12[%c0_169, %c13_170, %c0_171, %c0_172], %267 {strides = array<i32>} : memref<1x16x4x32xf32, #tpu.memory_space<vmem>>, vector<1x1x4x32xf32>,
    %268 = vector.extract_strided_slice %6 {offsets = [14, 0], sizes = [1, 128], strides = [1, 1]} : vector<16x128xf32> to vector<1x128xf32>
    %269 = vector.broadcast %268 : vector<1x128xf32> to vector<32x128xf32>
    %270 = arith.addf %269, %13 : vector<32x128xf32>
    %271 = math.tanh %270 : vector<32x128xf32>
    %272 = arith.truncf %271 : vector<32x128xf32> to vector<32x128xbf16>
    %cst_173 = arith.constant dense<0.000000e+00> : vector<4x32xf32>
    %273 = tpu.matmul %14, %272, %cst_173 {dimension_numbers = #tpu.dot_dimension_numbers<[1], [1], [0], [0], [0, 0, 1, 0], [], []>} : vector<4x128xbf16>, vector<32x128xbf16>, vector<4x32xf32> -> vector<4x32xf32>
    %c0_174 = arith.constant 0 : index
    %c14 = arith.constant 14 : index
    %c0_175 = arith.constant 0 : index
    %274 = vector.load %arg10[%c0_174, %c14, %c0_175] : memref<1x16x32xf32, #tpu.memory_space<vmem>>, vector<1x1x32xf32>
    %275 = vector.shape_cast %274 : vector<1x1x32xf32> to vector<1x32xf32>
    %276 = vector.broadcast %15 : vector<4x1xf32> to vector<4x32xf32>
    %277 = vector.broadcast %275 : vector<1x32xf32> to vector<4x32xf32>
    %278 = arith.mulf %276, %277 : vector<4x32xf32>
    %279 = arith.addf %273, %278 : vector<4x32xf32>
    %c0_176 = arith.constant 0 : index
    %c14_177 = arith.constant 14 : index
    %c0_178 = arith.constant 0 : index
    %c0_179 = arith.constant 0 : index
    %280 = vector.load %arg11[%c0_176, %c14_177, %c0_178, %c0_179] : memref<1x16x4x32xf32, #tpu.memory_space<vmem>>, vector<1x1x4x32xf32>
    %281 = vector.shape_cast %280 : vector<1x1x4x32xf32> to vector<4x32xf32>
    %282 = arith.addf %279, %281 : vector<4x32xf32>
    %c0_180 = arith.constant 0 : index
    %c14_181 = arith.constant 14 : index
    %c0_182 = arith.constant 0 : index
    %c0_183 = arith.constant 0 : index
    %283 = vector.load %arg12[%c0_180, %c14_181, %c0_182, %c0_183] : memref<1x16x4x32xf32, #tpu.memory_space<vmem>>, vector<1x1x4x32xf32>
    %284 = vector.shape_cast %283 : vector<1x1x4x32xf32> to vector<4x32xf32>
    %285 = vector.shape_cast %282 : vector<4x32xf32> to vector<1x1x4x32xf32>
    tpu.vector_store %arg12[%c0_180, %c14_181, %c0_182, %c0_183], %285 {strides = array<i32>} : memref<1x16x4x32xf32, #tpu.memory_space<vmem>>, vector<1x1x4x32xf32>,
    %286 = vector.extract_strided_slice %6 {offsets = [15, 0], sizes = [1, 128], strides = [1, 1]} : vector<16x128xf32> to vector<1x128xf32>
    %287 = vector.broadcast %286 : vector<1x128xf32> to vector<32x128xf32>
    %288 = arith.addf %287, %13 : vector<32x128xf32>
    %289 = math.tanh %288 : vector<32x128xf32>
    %290 = arith.truncf %289 : vector<32x128xf32> to vector<32x128xbf16>
    %cst_184 = arith.constant dense<0.000000e+00> : vector<4x32xf32>
    %291 = tpu.matmul %14, %290, %cst_184 {dimension_numbers = #tpu.dot_dimension_numbers<[1], [1], [0], [0], [0, 0, 1, 0], [], []>} : vector<4x128xbf16>, vector<32x128xbf16>, vector<4x32xf32> -> vector<4x32xf32>
    %c0_185 = arith.constant 0 : index
    %c15 = arith.constant 15 : index
    %c0_186 = arith.constant 0 : index
    %292 = vector.load %arg10[%c0_185, %c15, %c0_186] : memref<1x16x32xf32, #tpu.memory_space<vmem>>, vector<1x1x32xf32>
    %293 = vector.shape_cast %292 : vector<1x1x32xf32> to vector<1x32xf32>
    %294 = vector.broadcast %15 : vector<4x1xf32> to vector<4x32xf32>
    %295 = vector.broadcast %293 : vector<1x32xf32> to vector<4x32xf32>
    %296 = arith.mulf %294, %295 : vector<4x32xf32>
    %297 = arith.addf %291, %296 : vector<4x32xf32>
    %c0_187 = arith.constant 0 : index
    %c15_188 = arith.constant 15 : index
    %c0_189 = arith.constant 0 : index
    %c0_190 = arith.constant 0 : index
    %298 = vector.load %arg11[%c0_187, %c15_188, %c0_189, %c0_190] : memref<1x16x4x32xf32, #tpu.memory_space<vmem>>, vector<1x1x4x32xf32>
    %299 = vector.shape_cast %298 : vector<1x1x4x32xf32> to vector<4x32xf32>
    %300 = arith.addf %297, %299 : vector<4x32xf32>
    %c0_191 = arith.constant 0 : index
    %c15_192 = arith.constant 15 : index
    %c0_193 = arith.constant 0 : index
    %c0_194 = arith.constant 0 : index
    %301 = vector.load %arg12[%c0_191, %c15_192, %c0_193, %c0_194] : memref<1x16x4x32xf32, #tpu.memory_space<vmem>>, vector<1x1x4x32xf32>
    %302 = vector.shape_cast %301 : vector<1x1x4x32xf32> to vector<4x32xf32>
    %303 = vector.shape_cast %300 : vector<4x32xf32> to vector<1x1x4x32xf32>
    tpu.vector_store %arg12[%c0_191, %c15_192, %c0_193, %c0_194], %303 {strides = array<i32>} : memref<1x16x4x32xf32, #tpu.memory_space<vmem>>, vector<1x1x4x32xf32>,
    return
  }
  func.func @transform_0(%arg0: i32, %arg1: i32) -> (i32, i32, i32) {
    %c0_i32 = arith.constant 0 : i32
    %c0_i32_0 = arith.constant 0 : i32
    return %arg0, %arg1, %c0_i32 : i32, i32, i32
  }
  func.func @transform_1(%arg0: i32, %arg1: i32) -> (i32, i32, i32) {
    %c0_i32 = arith.constant 0 : i32
    %c0_i32_0 = arith.constant 0 : i32
    %c0_i32_1 = arith.constant 0 : i32
    return %arg0, %c0_i32, %c0_i32_0 : i32, i32, i32
  }
  func.func @transform_2(%arg0: i32, %arg1: i32) -> (i32, i32) {
    %c0_i32 = arith.constant 0 : i32
    %c0_i32_0 = arith.constant 0 : i32
    %c0_i32_1 = arith.constant 0 : i32
    return %c0_i32, %c0_i32_0 : i32, i32
  }
  func.func @transform_3(%arg0: i32, %arg1: i32) -> (i32, i32) {
    %c0_i32 = arith.constant 0 : i32
    %c0_i32_0 = arith.constant 0 : i32
    %c0_i32_1 = arith.constant 0 : i32
    return %c0_i32, %c0_i32_0 : i32, i32
  }
  func.func @transform_4(%arg0: i32, %arg1: i32) -> (i32, i32) {
    %c0_i32 = arith.constant 0 : i32
    %c0_i32_0 = arith.constant 0 : i32
    %c0_i32_1 = arith.constant 0 : i32
    return %c0_i32, %c0_i32_0 : i32, i32
  }
  func.func @transform_5(%arg0: i32, %arg1: i32) -> (i32, i32) {
    %c0_i32 = arith.constant 0 : i32
    %c0_i32_0 = arith.constant 0 : i32
    %c0_i32_1 = arith.constant 0 : i32
    return %c0_i32, %c0_i32_0 : i32, i32
  }
  func.func @transform_6(%arg0: i32, %arg1: i32) -> (i32, i32) {
    %c0_i32 = arith.constant 0 : i32
    %c0_i32_0 = arith.constant 0 : i32
    %c0_i32_1 = arith.constant 0 : i32
    return %c0_i32, %c0_i32_0 : i32, i32
  }
  func.func @transform_7(%arg0: i32, %arg1: i32) -> (i32, i32) {
    %c0_i32 = arith.constant 0 : i32
    %c0_i32_0 = arith.constant 0 : i32
    %c0_i32_1 = arith.constant 0 : i32
    return %c0_i32, %c0_i32_0 : i32, i32
  }
  func.func @transform_8(%arg0: i32, %arg1: i32) -> (i32, i32, i32) {
    %c0_i32 = arith.constant 0 : i32
    %c0_i32_0 = arith.constant 0 : i32
    return %arg0, %arg1, %c0_i32 : i32, i32, i32
  }
  func.func @transform_9(%arg0: i32, %arg1: i32) -> (i32, i32, i32, i32) {
    %c0_i32 = arith.constant 0 : i32
    %c0_i32_0 = arith.constant 0 : i32
    %c0_i32_1 = arith.constant 0 : i32
    return %arg0, %arg1, %c0_i32, %c0_i32_0 : i32, i32, i32, i32
  }
  func.func @transform_10(%arg0: i32, %arg1: i32) -> (i32, i32, i32, i32) {
    %c0_i32 = arith.constant 0 : i32
    %c0_i32_0 = arith.constant 0 : i32
    %c0_i32_1 = arith.constant 0 : i32
    return %arg0, %arg1, %c0_i32, %c0_i32_0 : i32, i32, i32, i32
  }
}

</mosaic_0001>

<bundles_post_ra>
// kernel: gold_dep_forward.1
= control target key start
LH: loop header
LB: loop body
LE: loop exit
PB: predicated region body
PF: predicated region fallthrough
CT: control target
= control target key end

     0   :  { %s2399_s13 = smov 0   ;;  %s2401_s14 = smov 0   ;;  %s3020_s0 = inlined_call_operand.vmem [shape: bf16[2,32,32], index: 0, kind: input, shape index: {}, may-alias: {0,1}]   ;;  %s3021_s1 = inlined_call_operand.vmem [shape: bf16[2,32,32], index: 1, kind: input, shape index: {}, may-alias: {0,1}]   ;;  %s3022_s2 = inlined_call_operand.vmem [shape: bf16[32,128], index: 2, kind: input, shape index: {}]   ;;  %s3023_s3 = inlined_call_operand.vmem [shape: f32[1,128], index: 3, kind: input, shape index: {}]   ;;  %s3024_s4 = inlined_call_operand.vmem [shape: bf16[32,128], index: 4, kind: input, shape index: {}]   ;;  %s3025_s5 = inlined_call_operand.vmem [shape: f32[1,128], index: 5, kind: input, shape index: {}]   ;;  %s3026_s6 = inlined_call_operand.vmem [shape: bf16[4,128], index: 6, kind: input, shape index: {}]   ;;  %s3027_s7 = inlined_call_operand.vmem [shape: f32[4,1], index: 7, kind: input, shape index: {}]   ;;  %s3028_s8 = inlined_call_operand.vmem [shape: f32[2,32,32], index: 8, kind: input, shape index: {}]   ;;  %s3029_s9 = inlined_call_operand.vmem [shape: f32[2,32,4,32], index: 9, kind: input, shape index: {}]   ;;  %s3030_s10 = inlined_call_operand.vmem [shape: f32[2,32,4,32], index: 10, kind: output, shape index: {}]  }
   0x1   :  { %s2403_s15 = smov 0   ;;  %s2405_s16 = smov 0  }
   0x2   :  { %s2407_s17 = smov 0  }
   0x3 LB: > { %s29_s18 = sadd.s32 1, %s2331_s15  ;;  %s32_s19 = sadd.s32 1, %s2335_s16  ;;  %s2339_s17 = sphi %s2407_s17, %s20_s17   ;;  %s2335_s16 = sphi %s2405_s16, %s3034_s16   ;;  %s2331_s15 = sphi %s2403_s15, %s3033_s15   ;;  %s2327_s14 = sphi %s2401_s14, %s3032_s14   ;;  %s2323_s13 = sphi %s2399_s13, %s3031_s13  }
   0x4   : > { %p30_p0 = scmp.ge.s32.totalorder %s29_s18, 2  ;;  %p1847_p1 = scmp.ge.s32.totalorder %s2339_s17, 1 }
   0x5   : > { %p377_p2 = scmp.lt.s32.totalorder %s2339_s17, 5 }
   0x6   : > { %s3036_s18 = smov (%p30_p0, %s29_s18), 0  ;;  %s3038_s19 = smov (!%p30_p0, %s32_s19), %s2335_s16 }
   0x7   : > { %p378_p3 = pnand %p1847_p1, %p377_p2  ;;  %p34_p4 = scmp.ge.s32.totalorder %s3038_s19, 2 }
   0x8   : > { %p447_p5 = scmp.lt.s32.totalorder (!%p378_p3), %s2327_s14, 1  ;;  %s1848_s28 = sshll.u32 (!%p378_p3), %s2323_s13, 1 }
   0x9   : > { %s3040_s19 = smov (%p34_p4, %s3038_s19), 0  ;;  %381 = sbr.rel (%p378_p3) target bundleno = 569 (0x239), region = 60 }
   0xa   : > { %p449_p6 = scmp.lt.s32.totalorder (!%p378_p3), %s1848_s28, 3 }
   0xe   : > { %v2166_v0 = vld [vmem:[%s3024_s4 + $0x8] sm:$0xff]   ;;  %v2341_v1 = vmov 0.0   ;;  %v2168_v3 = vld [vmem:[%s3024_s4] sm:$0xff]   ;;  %vm2342_vm0 = vmmov 0   ;;  %s3042_s14 = smov (!%p447_p5, %s2327_s14), 1  ;;  %vm522_vm1 = vcmask 261120   ;;  %v661_v10 = vlaneseq }
   0xf   : > { %1978 = vmatprep.subr.bf16.mxu0 %v2341_v1  ;;  %v2167_v2 = vld [vmem:[%s3022_s2 + $0x8] sm:$0xff]   ;;  %1986 = vmatprep.subr.bf16.mxu1 %v2166_v0  ;;  %v2169_v4 = vld [vmem:[%s3022_s2] sm:$0xff]   ;;  %s1922_s29 = sshll.u32 %s3042_s14, 4  ;;  %s3044_s28 = smov (!%p449_p6, %s1848_s28), 3  ;;  %v2343_v9 = vmov 0   ;;  %vm728_vm2 = vcmask 257024  }
  0x10   : > { %1982 = vmatprep.mubr.msk.bf16.mxu0 %vm2342_vm0, %v2341_v1  ;;  %1979 = vmatpush3.bf16.msra.mxu0 %v2167_v2  ;;  %s460_s12 = scalar_lea.vmem %s3021_s1, %s1922_s29  ;;  %s1849_s20 = sshll.u32 %s3042_s14, 2  ;;  %v660_v8 = vld [vmem:[%s3027_s7] sm:$0xf]  ;;  %v2470_v12 = vshrl.u32 %v661_v10, 7 }
  0x11   : > { %1987 = vmatpush3.bf16.msra.mxu1 %v2166_v0  ;;  %1980 = vmatprep.subr.bf16.mxu0 %v2341_v1  ;;  %v2170_v5 = vld [vmem:[%s460_s12] sm:$0xff]   ;;  %v2172_v6 = vld [vmem:[%s460_s12 + $0x8] sm:$0xff]   ;;  %s2457_s21 = sadd.s32 %s1849_s20, %s3044_s28  ;;  %s1857_s23 = sshll.u32 %s3042_s14, 5 }
  0x12   : > { %1988 = vmatprep.subr.bf16.mxu1 %v2168_v3  ;;  %1990 = vmatprep.mubr.msk.bf16.mxu1 %vm522_vm1, %v2170_v5  ;;  %s1850_s22 = sshll.u32 %s2457_s21, 2  ;;  %v1862_v14 = vld [vmem:[%s3023_s3] ss:$0 sm:$0xff]  ;;  %v663_v16 = vsub.s32 0, %v2470_v12  ;;  %v732_v17 = vsub.s32 1, %v2470_v12  ;;  %v797_v24 = vsub.s32 2, %v2470_v12 }
  0x13   : > { %s454_s25 = scalar_lea.vmem %s3020_s0, %s1850_s22  ;;  %2165 = vset.pattern.permute.xlu0 %v2343_v9  ;;  %v1867_v19 = vld [vmem:[%s3025_s5] ss:$0 sm:$0xff]  ;;  %v862_v25 = vsub.s32 3, %v2470_v12  ;;  %v927_v26 = vsub.s32 4, %v2470_v12  ;;  %v992_v27 = vsub.s32 5, %v2470_v12  ;;  %v1057_v34 = vsub.s32 6, %v2470_v12 }
  0x14   : > { %1981 = vmatpush3.bf16.msra.mxu0 %v2169_v4  ;;  %v2171_v7 = vld [vmem:[%s454_s25] sm:$0xff]   ;;  %678 = vperm.xlu0 %2165, %v660_v8   ;;  %v1122_v35 = vsub.s32 7, %v2470_v12  ;;  %s1856_s22 = sshll.u32 %s2323_s13, 4  ;;  %s1855_s24 = sshll.u32 %s2457_s21, 3 }
  0x15   : > { %1989 = vmatpush3.bf16.msra.mxu1 %v2168_v3  ;;  %1994 = vmatprep.subr.bf16.mxu0 %v2341_v1  ;;  %p474_p7 = scmp.lt.s32.totalorder %s1856_s22, 31  ;;  %s2911_s28 = scalar_lea.vmem %s3028_s8, %s1855_s24 }
  0x16   : > { %2002 = vmatprep.subr.bf16.mxu1 %v2341_v1 }
  0x17   : > { %1983 = vmatmul.mubr.msk.bf16.vlgmr.msra.gmra.mxu0 %vm522_vm1, %v2171_v7  ;;  %s3046_s22 = smov (!%p474_p7, %s1856_s22), 31 }
  0x18   : > { %1991 = vmatmul.mubr.msk.bf16.vlgmr.msra.gmra.mxu1 %vm522_vm1, %v2172_v6  ;;  %1998 = vmatprep.mubr.msk.bf16.mxu0 %vm2342_vm0, %v2341_v1  ;;  %s477_s25 = sadd.s32 %s1857_s23, %s3046_s22 }
  0x19   : > { %2006 = vmatprep.mubr.msk.bf16.mxu1 %vm2342_vm0, %v2341_v1  ;;  %s1858_s29 = sshll.u32 %s477_s25, 2 }
  0x1a   : > { %s2920_s13 = scalar_lea.vmem %s3029_s9, %s1858_s29  ;;  %s2928_s12 = scalar_lea.vmem %s3030_s10, %s1858_s29 }
  0xd7   : > { %v560_v18 = vpop.f32.mrf.mxu0 }
  0xd8   : > { %v1992_v11 = vpop.f32.mrf.mxu1  ;;  %v561_v20 = vadd.f32 %v1862_v14, %v560_v18 }
  0xd9   : > { %v1984_v23 = vpop.f32.mrf.mxu0  ;;  %v2486_v28 = vadd.f32 %v1992_v11, %v1867_v19 }
  0xda   : > { %v644_v13 = vpop.f32.mrf.mxu1  ;;  %v664_v30 = vrot.slane %v561_v20, %v663_v16  ;;  %v733_v31 = vrot.slane %v561_v20, %v732_v17  ;;  %v798_v41 = vrot.slane %v561_v20, %v797_v24  ;;  %v863_v42 = vrot.slane %v561_v20, %v862_v25 }
  0xdb   : > { %v2488_v29 = vadd.f32 %v1867_v19, %v644_v13  ;;  %v563_v32 = vpop.f32.mrf.mxu0  ;;  %v928_v44 = vrot.slane %v561_v20, %v927_v26  ;;  %v993_v45 = vrot.slane %v561_v20, %v992_v27  ;;  %v2504_v47 = vrot.slane %v561_v20, %v1057_v34 }
  0xdc   : > { %v1993_v15 = vpop.f32.mrf.mxu1  ;;  %v667_v36 = vadd.f32 %v664_v30, %v2486_v28  ;;  %v736_v38 = vadd.f32 %v733_v31, %v2486_v28  ;;  %v2508_v48 = vrot.slane %v561_v20, %v1122_v35  ;;  %v2510_v49 = vadd.f32 %v1862_v14, %v563_v32 }
  0xdd   : > { %v2480_v21 = vadd.f32 %v1993_v15, %v1867_v19  ;;  %v1985_v39 = vpop.f32.mrf.mxu0  ;;  %v665_v43 = vadd.f32 %v664_v30, %v2488_v29  ;;  %v734_v50 = vadd.f32 %v733_v31, %v2488_v29  ;;  %v801_v52 = vadd.f32 %v798_v41, %v2486_v28 }
  0xde   : > { %v647_v22 = vpop.f32.mrf.mxu1  ;;  %2173 = vtanh.f32 %v667_v36  ;;  %v866_v54 = vadd.f32 %v863_v42, %v2486_v28  ;;  %v799_v56 = vadd.f32 %v798_v41, %v2488_v29  ;;  %v864_v58 = vadd.f32 %v863_v42, %v2488_v29 }
  0xdf   : > { %v2490_v33 = vadd.f32 %v1867_v19, %v647_v22  ;;  %v668_v37 = vadd.f32 %v664_v30, %v2480_v21  ;;  %v737_v40 = vadd.f32 %v733_v31, %v2480_v21  ;;  %v802_v53 = vadd.f32 %v798_v41, %v2480_v21 }
  0xe0   : > { %v867_v55 = vadd.f32 %v863_v42, %v2480_v21  ;;  %v931_v60 = vadd.f32 %v928_v44, %v2486_v28  ;;  %v932_v61 = vadd.f32 %v928_v44, %v2480_v21  ;;  %v996_v62 = vadd.f32 %v993_v45, %v2486_v28 }
  0xe1   : > { %2175 = vtanh.f32 %v668_v37  ;;  %v666_v46 = vadd.f32 %v664_v30, %v2490_v33  ;;  %v735_v51 = vadd.f32 %v733_v31, %v2490_v33  ;;  %v800_v57 = vadd.f32 %v798_v41, %v2490_v33 }
  0xe2   : > { %2177 = vtanh.f32 %v736_v38  ;;  %v865_v59 = vadd.f32 %v863_v42, %v2490_v33  ;;  %v997_v63 = vadd.f32 %v993_v45, %v2480_v21  ;;  %v929_v0 = vadd.f32 %v928_v44, %v2488_v29 }
  0xe3   : > { %2179 = vtanh.f32 %v737_v40  ;;  %v2528_v2 = vadd.f32 %v928_v44, %v2490_v33  ;;  %v2531_v3 = vadd.f32 %v993_v45, %v2488_v29  ;;  %v2534_v4 = vadd.f32 %v993_v45, %v2490_v33 }
  0xe4   : > { %2181 = vtanh.f32 %v665_v43  ;;  %v1188_v5 = vrot.slane %v2510_v49, %v663_v16  ;;  %v1253_v6 = vrot.slane %v2510_v49, %v732_v17  ;;  %v1318_v7 = vrot.slane %v2510_v49, %v797_v24 }
  0xe5   : > { %2183 = vtanh.f32 %v666_v46  ;;  %v1383_v8 = vrot.slane %v2510_v49, %v862_v25  ;;  %v1448_v9 = vrot.slane %v2510_v49, %v927_v26  ;;  %v1513_v41 = vrot.slane %v2510_v49, %v992_v27 }
  0xe6   : > { %2185 = vtanh.f32 %v734_v50  ;;  %v2542_v10 = vadd.f32 %v1188_v5, %v2486_v28  ;;  %v2545_v11 = vadd.f32 %v1188_v5, %v2480_v21  ;;  %v2548_v13 = vadd.f32 %v1253_v6, %v2486_v28 }
  0xe7   : > { %2187 = vtanh.f32 %v735_v51  ;;  %v2551_v14 = vadd.f32 %v1253_v6, %v2480_v21  ;;  %v2554_v15 = vadd.f32 %v1188_v5, %v2488_v29  ;;  %v2557_v16 = vadd.f32 %v1188_v5, %v2490_v33 }
  0xe8   : > { %2189 = vtanh.f32 %v801_v52  ;;  %v2560_v17 = vadd.f32 %v1253_v6, %v2488_v29  ;;  %v2563_v18 = vadd.f32 %v1253_v6, %v2490_v33  ;;  %v2566_v19 = vadd.f32 %v1318_v7, %v2486_v28 }
  0xe9   : > { %2191 = vtanh.f32 %v802_v53  ;;  %v2569_v22 = vadd.f32 %v1318_v7, %v2480_v21  ;;  %v2572_v23 = vadd.f32 %v1383_v8, %v2486_v28  ;;  %v2575_v24 = vadd.f32 %v1383_v8, %v2480_v21 }
  0xea   : > { %2193 = vtanh.f32 %v866_v54  ;;  %v2578_v26 = vadd.f32 %v1318_v7, %v2488_v29  ;;  %v2581_v30 = vadd.f32 %v1318_v7, %v2490_v33  ;;  %v2584_v31 = vadd.f32 %v1383_v8, %v2488_v29 }
  0xeb   : > { %2195 = vtanh.f32 %v867_v55  ;;  %v2174_v20 = vpop.eup %2173  ;;  %v2587_v37 = vadd.f32 %v1383_v8, %v2490_v33  ;;  %v2590_v38 = vadd.f32 %v1448_v9, %v2486_v28  ;;  %v2593_v40 = vadd.f32 %v1448_v9, %v2480_v21 }
  0xec   : > { %2197 = vtanh.f32 %v799_v56  ;;  %v2599_v42 = vadd.f32 %v1448_v9, %v2488_v29  ;;  %v2602_v45 = vadd.f32 %v1448_v9, %v2490_v33  ;;  %v1578_v46 = vrot.slane %v2510_v49, %v1057_v34 }
  0xed   : > { %2199 = vtanh.f32 %v800_v57  ;;  %v2609_v27 = vadd.f32 %v1513_v41, %v2486_v28  ;;  %v2612_v51 = vadd.f32 %v1513_v41, %v2480_v21  ;;  %v2615_v52 = vadd.f32 %v1513_v41, %v2488_v29 }
  0xee   : > { %v2176_v25 = vpop.eup %2175  ;;  %2201 = vtanh.f32 %v864_v58  ;;  %v1061_v54 = vadd.f32 %v2504_v47, %v2486_v28  ;;  %v2620_v34 = vadd.f32 %v1513_v41, %v2490_v33  ;;  %v2623_v55 = vadd.f32 %v1578_v46, %v2486_v28 }
  0xef   : > { %v2178_v32 = vpop.eup %2177  ;;  %v674_v36 = vpack.c.bf16 %v2176_v25, %v2174_v20  ;;  %2203 = vtanh.f32 %v865_v59  ;;  %v2627_v57 = vadd.f32 %v1578_v46, %v2480_v21  ;;  %v1643_v58 = vrot.slane %v2510_v49, %v1122_v35 }
  0xf0   : > { %v2180_v39 = vpop.eup %2179  ;;  %2205 = vtanh.f32 %v931_v60  ;;  %v2633_v59 = vadd.f32 %v1578_v46, %v2488_v29  ;;  %v1127_v6 = vadd.f32 %v2508_v48, %v2480_v21  ;;  %v1060_v20 = vadd.f32 %v2504_v47, %v2490_v33 }
  0xf1   : > { %v2182_v43 = vpop.eup %2181  ;;  %1995 = vmatpush3.bf16.xpose.msra.mxu0 %v674_v36  ;;  %v743_v44 = vpack.c.bf16 %v2180_v39, %v2178_v32  ;;  %2207 = vtanh.f32 %v932_v61  ;;  %v1062_v61 = vadd.f32 %v2504_v47, %v2480_v21  ;;  %v2645_v12 = vadd.f32 %v1643_v58, %v2486_v28 }
  0xf2   : > { %v2184_v50 = vpop.eup %2183  ;;  %1996 = vmatprep.subr.bf16.mxu0 %v2341_v1  ;;  %2209 = vtanh.f32 %v996_v62  ;;  %v1126_v62 = vadd.f32 %v2508_v48, %v2486_v28  ;;  %v2648_v35 = vadd.f32 %v1643_v58, %v2480_v21  ;;  %v2651_v49 = vadd.f32 %v1643_v58, %v2488_v29 }
  0xf3   : > { %v2186_v53 = vpop.eup %2185  ;;  %2003 = vmatpush3.bf16.xpose.msra.mxu1 %v743_v44  ;;  %2211 = vtanh.f32 %v997_v63  ;;  %v2641_v63 = vadd.f32 %v1578_v46, %v2490_v33  ;;  %v673_v5 = vpack.c.bf16 %v2184_v50, %v2182_v43  ;;  %v2657_v7 = vadd.f32 %v1643_v58, %v2490_v33 }
  0xf4   : > { %v2188_v56 = vpop.eup %2187  ;;  %2004 = vmatprep.subr.bf16.mxu1 %v2341_v1  ;;  %2213 = vtanh.f32 %v929_v0  ;;  %v1059_v28 = vadd.f32 %v2504_v47, %v2488_v29  ;;  %v1124_v21 = vadd.f32 %v2508_v48, %v2488_v29  ;;  %v1125_v32 = vadd.f32 %v2508_v48, %v2490_v33  ;;  %v2672_v47 = vld [vmem:[%s3026_s6] sm:$0x3] }
  0xf5   : > { %v2190_v60 = vpop.eup %2189  ;;  %2215 = vtanh.f32 %v2528_v2  ;;  %v742_v9 = vpack.c.bf16 %v2188_v56, %v2186_v53 }
  0xf6   : > { %v2192_v0 = vpop.eup %2191  ;;  %2217 = vtanh.f32 %v2531_v3 }
  0xf7   : > { %v2194_v2 = vpop.eup %2193  ;;  %2219 = vtanh.f32 %v2534_v4  ;;  %v808_v43 = vpack.c.bf16 %v2192_v0, %v2190_v60 }
  0xf8   : > { %v2196_v3 = vpop.eup %2195  ;;  %2221 = vtanh.f32 %v1061_v54 }
  0xf9   : > { %v2198_v8 = vpop.eup %2197  ;;  %1997 = vmatpush3.bf16.xpose.msra.mxu0 %v673_v5  ;;  %2223 = vtanh.f32 %v1062_v61  ;;  %v873_v48 = vpack.c.bf16 %v2196_v3, %v2194_v2 }
  0xfa   : > { %v2200_v25 = vpop.eup %2199  ;;  %2010 = vmatprep.subr.bf16.mxu0 %v2341_v1  ;;  %2225 = vtanh.f32 %v1126_v62 }
  0xfb   : > { %v2202_v4 = vpop.eup %2201  ;;  %2005 = vmatpush3.bf16.xpose.msra.mxu1 %v742_v9  ;;  %2227 = vtanh.f32 %v1127_v6  ;;  %v807_v54 = vpack.c.bf16 %v2200_v25, %v2198_v8 }
  0xfc   : > { %v2204_v36 = vpop.eup %2203  ;;  %2018 = vmatprep.subr.bf16.mxu1 %v2341_v1  ;;  %2229 = vtanh.f32 %v1059_v28 }
  0xfd   : > { %v2206_v39 = vpop.eup %2205  ;;  %2231 = vtanh.f32 %v1060_v20 }
  0xfe   : > { %v2208_v41 = vpop.eup %2207  ;;  %2233 = vtanh.f32 %v1124_v21 }
  0xff   : > { %v2674_v29 = vpop.eup %2209  ;;  %2235 = vtanh.f32 %v1125_v32  ;;  %v938_v58 = vpack.c.bf16 %v2208_v41, %v2206_v39 }
 0x100   : > { %v2676_v44 = vpop.eup %2211  ;;  %1999 = vmatmul.mubr.bf16.vlgmr.msra.gmra.mxu0 %v2672_v47  ;;  %2237 = vtanh.f32 %v2542_v10 }
 0x101   : > { %v2680_v33 = vpop.eup %2213  ;;  %2011 = vmatpush3.bf16.xpose.msra.mxu0 %v808_v43  ;;  %2014 = vmatprep.mubr.msk.bf16.mxu0 %vm2342_vm0, %v2341_v1  ;;  %2239 = vtanh.f32 %v2545_v11 }
 0x102   : > { %v2685_v46 = vpop.eup %2215  ;;  %2007 = vmatmul.mubr.bf16.vlgmr.msra.gmra.mxu1 %v2672_v47  ;;  %2012 = vmatprep.subr.bf16.mxu0 %v2341_v1  ;;  %2241 = vtanh.f32 %v2548_v13 }
 0x103   : > { %v2690_v50 = vpop.eup %2217  ;;  %2019 = vmatpush3.bf16.xpose.msra.mxu1 %v873_v48  ;;  %2022 = vmatprep.mubr.msk.bf16.mxu1 %vm2342_vm0, %v2341_v1  ;;  %2243 = vtanh.f32 %v2551_v14 }
 0x104   : > { %v2695_v10 = vpop.eup %2219  ;;  %2020 = vmatprep.subr.bf16.mxu1 %v2341_v1  ;;  %2245 = vtanh.f32 %v2554_v15  ;;  %v872_v15 = vpack.c.bf16 %v2204_v36, %v2202_v4 }
 0x105   : > { %v2699_v11 = vpop.eup %2221  ;;  %2247 = vtanh.f32 %v2557_v16 }
 0x106   : > { %v2702_v53 = vpop.eup %2223  ;;  %2249 = vtanh.f32 %v2560_v17 }
 0x107   : > { %v2705_v13 = vpop.eup %2225  ;;  %2251 = vtanh.f32 %v2563_v18 }
 0x108   : > { %v2708_v14 = vpop.eup %2227  ;;  %2253 = vtanh.f32 %v2566_v19 }
 0x109   : > { %v2711_v56 = vpop.eup %2229  ;;  %2013 = vmatpush3.bf16.xpose.msra.mxu0 %v807_v54  ;;  %2255 = vtanh.f32 %v2569_v22 }
 0x10a   : > { %v2714_v16 = vpop.eup %2231  ;;  %2026 = vmatprep.subr.bf16.mxu0 %v2341_v1  ;;  %2257 = vtanh.f32 %v2572_v23 }
 0x10b   : > { %v2718_v17 = vpop.eup %2233  ;;  %2021 = vmatpush3.bf16.xpose.msra.mxu1 %v872_v15  ;;  %2259 = vtanh.f32 %v2575_v24  ;;  %v1067_v43 = vpack.c.bf16 %v2714_v16, %v2711_v56  ;;  %v1875_v56 = vld [vmem:[%s2911_s28 + $0x1] ss:$0 sm:$0xff] }
 0x10c   : > { %v2721_v18 = vpop.eup %2235  ;;  %2034 = vmatprep.subr.bf16.mxu1 %v2341_v1  ;;  %2261 = vtanh.f32 %v2578_v26 }
 0x10d   : > { %v2725_v19 = vpop.eup %2237  ;;  %2263 = vtanh.f32 %v2581_v30  ;;  %v1003_v30 = vpack.c.bf16 %v2676_v44, %v2674_v29 }
 0x10e   : > { %v2728_v22 = vpop.eup %2239  ;;  %2265 = vtanh.f32 %v2584_v31 }
 0x10f   : > { %v2731_v23 = vpop.eup %2241  ;;  %v1198_v24 = vpack.c.bf16 %v2728_v22, %v2725_v19  ;;  %2267 = vtanh.f32 %v2587_v37  ;;  %v1876_v22 = vld [vmem:[%s2920_s13 + $0x4] sm:$0xf] }
 0x110   : > { %v2736_v60 = vpop.eup %2243  ;;  %2015 = vmatmul.mubr.bf16.vlgmr.msra.gmra.mxu0 %v2672_v47  ;;  %2269 = vtanh.f32 %v2590_v38 }
 0x111   : > { %v2740_v26 = vpop.eup %2245  ;;  %2027 = vmatpush3.bf16.xpose.msra.mxu0 %v938_v58  ;;  %2030 = vmatprep.mubr.msk.bf16.mxu0 %vm2342_vm0, %v2341_v1  ;;  %v1263_v31 = vpack.c.bf16 %v2736_v60, %v2731_v23  ;;  %2271 = vtanh.f32 %v2593_v40 }
 0x112   : > { %v2749_v37 = vpop.eup %2247  ;;  %2023 = vmatmul.mubr.bf16.vlgmr.msra.gmra.mxu1 %v2672_v47  ;;  %2028 = vmatprep.subr.bf16.mxu0 %v2341_v1  ;;  %2273 = vtanh.f32 %v2609_v27 }
 0x113   : > { %v2754_v38 = vpop.eup %2249  ;;  %2035 = vmatpush3.bf16.xpose.msra.mxu1 %v1003_v30  ;;  %2038 = vmatprep.mubr.msk.bf16.mxu1 %vm2342_vm0, %v2341_v1  ;;  %v1197_v61 = vpack.c.bf16 %v2749_v37, %v2740_v26  ;;  %2275 = vtanh.f32 %v2612_v51  ;;  %v937_v51 = vpack.c.bf16 %v2685_v46, %v2680_v33  ;;  %v1132_v46 = vpack.c.bf16 %v2721_v18, %v2718_v17  ;;  %v726_v17 = vld [vmem:[%s2920_s13] sm:$0xf] }
 0x114   : > { %v2761_v40 = vpop.eup %2251  ;;  %2036 = vmatprep.subr.bf16.mxu1 %v2341_v1  ;;  %2277 = vtanh.f32 %v2599_v42 }
 0x115   : > { %v2765_v62 = vpop.eup %2253  ;;  %v1262_v27 = vpack.c.bf16 %v2761_v40, %v2754_v38  ;;  %2279 = vtanh.f32 %v2602_v45  ;;  %v1002_v45 = vpack.c.bf16 %v2695_v10, %v2690_v50  ;;  %v1881_v40 = vld [vmem:[%s2911_s28 + $0x3] ss:$0 sm:$0xff] }
 0x116   : > { %v2770_v0 = vpop.eup %2255  ;;  %2281 = vtanh.f32 %v2615_v52 }
 0x117   : > { %v2773_v2 = vpop.eup %2257  ;;  %v1328_v5 = vpack.c.bf16 %v2770_v0, %v2765_v62  ;;  %2283 = vtanh.f32 %v2620_v34 }
 0x118   : > { %v2780_v42 = vpop.eup %2259  ;;  %2285 = vtanh.f32 %v2623_v55 }
 0x119   : > { %v2783_v6 = vpop.eup %2261  ;;  %2029 = vmatpush3.bf16.xpose.msra.mxu0 %v937_v51  ;;  %v1393_v52 = vpack.c.bf16 %v2780_v42, %v2773_v2  ;;  %2287 = vtanh.f32 %v2627_v57  ;;  %v1879_v2 = vld [vmem:[%s2920_s13 + $0x8] sm:$0xf]  ;;  %v1882_v42 = vld [vmem:[%s2920_s13 + $0xc] sm:$0xf] }
 0x11a   : > { %v2790_v3 = vpop.eup %2263  ;;  %2042 = vmatprep.subr.bf16.mxu0 %v2341_v1  ;;  %2289 = vtanh.f32 %v2645_v12 }
 0x11b   : > { %v2794_v34 = vpop.eup %2265  ;;  %2037 = vmatpush3.bf16.xpose.msra.mxu1 %v1002_v45  ;;  %v1327_v55 = vpack.c.bf16 %v2790_v3, %v2783_v6  ;;  %2291 = vtanh.f32 %v2648_v35  ;;  %v1068_v35 = vpack.c.bf16 %v2702_v53, %v2699_v11 }
 0x11c   : > { %v2799_v28 = vpop.eup %2267  ;;  %2050 = vmatprep.subr.bf16.mxu1 %v2341_v1  ;;  %2293 = vtanh.f32 %v2633_v59 }
 0x11d   : > { %v2803_v57 = vpop.eup %2269  ;;  %v1392_v8 = vpack.c.bf16 %v2799_v28, %v2794_v34  ;;  %2295 = vtanh.f32 %v2641_v63  ;;  %v1133_v63 = vpack.c.bf16 %v2708_v14, %v2705_v13  ;;  %v1874_v14 = vld [vmem:[%s2911_s28] ss:$0 sm:$0xff] }
 0x11e   : > { %v2808_v12 = vpop.eup %2271  ;;  %2297 = vtanh.f32 %v2651_v49 }
 0x11f   : > { %v2811_v9 = vpop.eup %2273  ;;  %v1458_v20 = vpack.c.bf16 %v2808_v12, %v2803_v57  ;;  %2299 = vtanh.f32 %v2657_v7  ;;  %v1884_v12 = vld [vmem:[%s2911_s28 + $0x4] ss:$0 sm:$0xff] }
 0x120   : > { %v2818_v59 = vpop.eup %2275  ;;  %2031 = vmatmul.mubr.bf16.vlgmr.msra.gmra.mxu0 %v2672_v47 }
 0x121   : > { %v2821_v25 = vpop.eup %2277  ;;  %2043 = vmatpush3.bf16.xpose.msra.mxu0 %v1068_v35  ;;  %2046 = vmatprep.mubr.msk.bf16.mxu0 %vm2342_vm0, %v2341_v1  ;;  %v1523_v49 = vpack.c.bf16 %v2818_v59, %v2811_v9  ;;  %v1887_v9 = vld [vmem:[%s2911_s28 + $0x5] ss:$0 sm:$0xff] }
 0x122   : > { %v2280_v21 = vpop.eup %2279  ;;  %2039 = vmatmul.mubr.bf16.vlgmr.msra.gmra.mxu1 %v2672_v47  ;;  %2044 = vmatprep.subr.bf16.mxu0 %v2341_v1 }
 0x123   : > { %v2282_v7 = vpop.eup %2281  ;;  %2051 = vmatpush3.bf16.xpose.msra.mxu1 %v1133_v63  ;;  %2054 = vmatprep.mubr.msk.bf16.mxu1 %vm2342_vm0, %v2341_v1  ;;  %v1457_v4 = vpack.c.bf16 %v2280_v21, %v2821_v25  ;;  %v1885_v25 = vld [vmem:[%s2920_s13 + $0x10] sm:$0xf]  ;;  %v1888_v21 = vld [vmem:[%s2920_s13 + $0x14] sm:$0xf] }
 0x124   : > { %v2284_v32 = vpop.eup %2283  ;;  %2052 = vmatprep.subr.bf16.mxu1 %v2341_v1 }
 0x125   : > { %v2286_v36 = vpop.eup %2285  ;;  %v1522_v39 = vpack.c.bf16 %v2284_v32, %v2282_v7 }
 0x126   : > { %v2288_v41 = vpop.eup %2287 }
 0x127   : > { %v2290_v29 = vpop.eup %2289  ;;  %v1588_v44 = vpack.c.bf16 %v2288_v41, %v2286_v36 }
 0x128   : > { %v2292_v33 = vpop.eup %2291 }
 0x129   : > { %v2294_v48 = vpop.eup %2293  ;;  %2045 = vmatpush3.bf16.xpose.msra.mxu0 %v1067_v43  ;;  %v1653_v50 = vpack.c.bf16 %v2292_v33, %v2290_v29  ;;  %v1890_v33 = vld [vmem:[%s2911_s28 + $0x6] ss:$0 sm:$0xff] }
 0x12a   : > { %v2296_v10 = vpop.eup %2295  ;;  %2058 = vmatprep.subr.bf16.mxu0 %v2341_v1 }
 0x12b   : > { %v2298_v11 = vpop.eup %2297  ;;  %2053 = vmatpush3.bf16.xpose.msra.mxu1 %v1132_v46  ;;  %v1587_v53 = vpack.c.bf16 %v2296_v10, %v2294_v48  ;;  %v1893_v48 = vld [vmem:[%s2911_s28 + $0x7] ss:$0 sm:$0xff] }
 0x12c   : > { %v2300_v13 = vpop.eup %2299  ;;  %2066 = vmatprep.subr.bf16.mxu1 %v2341_v1 }
 0x12d   : > { %v1652_v54 = vpack.c.bf16 %v2300_v13, %v2298_v11  ;;  %v1891_v11 = vld [vmem:[%s2920_s13 + $0x18] sm:$0xf] }
 0x130   : > { %2047 = vmatmul.mubr.bf16.vlgmr.msra.gmra.mxu0 %v2672_v47 }
 0x131   : > { %2059 = vmatpush3.bf16.xpose.msra.mxu0 %v1198_v24  ;;  %2062 = vmatprep.mubr.msk.bf16.mxu0 %vm2342_vm0, %v2341_v1 }
 0x132   : > { %2055 = vmatmul.mubr.bf16.vlgmr.msra.gmra.mxu1 %v2672_v47  ;;  %2060 = vmatprep.subr.bf16.mxu0 %v2341_v1 }
 0x133   : > { %2067 = vmatpush3.bf16.xpose.msra.mxu1 %v1263_v31  ;;  %2070 = vmatprep.mubr.msk.bf16.mxu1 %vm2342_vm0, %v2341_v1 }
 0x134   : > { %2068 = vmatprep.subr.bf16.mxu1 %v2341_v1 }
 0x139   : > { %2061 = vmatpush3.bf16.xpose.msra.mxu0 %v1197_v61  ;;  %v1878_v61 = vld [vmem:[%s2911_s28 + $0x2] ss:$0 sm:$0xff] }
 0x13a   : > { %2074 = vmatprep.subr.bf16.mxu0 %v2341_v1 }
 0x13b   : > { %2069 = vmatpush3.bf16.xpose.msra.mxu1 %v1262_v27 }
 0x13c   : > { %2082 = vmatprep.subr.bf16.mxu1 %v2341_v1 }
 0x140   : > { %2063 = vmatmul.mubr.bf16.vlgmr.msra.gmra.mxu0 %v2672_v47 }
 0x141   : > { %2075 = vmatpush3.bf16.xpose.msra.mxu0 %v1328_v5  ;;  %2078 = vmatprep.mubr.msk.bf16.mxu0 %vm2342_vm0, %v2341_v1 }
 0x142   : > { %2071 = vmatmul.mubr.bf16.vlgmr.msra.gmra.mxu1 %v2672_v47  ;;  %2076 = vmatprep.subr.bf16.mxu0 %v2341_v1 }
 0x143   : > { %2083 = vmatpush3.bf16.xpose.msra.mxu1 %v1393_v52  ;;  %2086 = vmatprep.mubr.msk.bf16.mxu1 %vm2342_vm0, %v2341_v1 }
 0x144   : > { %2084 = vmatprep.subr.bf16.mxu1 %v2341_v1 }
 0x149   : > { %2077 = vmatpush3.bf16.xpose.msra.mxu0 %v1327_v55 }
 0x14a   : > { %2090 = vmatprep.subr.bf16.mxu0 %v2341_v1 }
 0x14b   : > { %2085 = vmatpush3.bf16.xpose.msra.mxu1 %v1392_v8 }
 0x14c   : > { %2098 = vmatprep.subr.bf16.mxu1 %v2341_v1 }
 0x150   : > { %2079 = vmatmul.mubr.bf16.vlgmr.msra.gmra.mxu0 %v2672_v47 }
 0x151   : > { %2091 = vmatpush3.bf16.xpose.msra.mxu0 %v1458_v20  ;;  %2094 = vmatprep.mubr.msk.bf16.mxu0 %vm2342_vm0, %v2341_v1 }
 0x152   : > { %2087 = vmatmul.mubr.bf16.vlgmr.msra.gmra.mxu1 %v2672_v47  ;;  %2092 = vmatprep.subr.bf16.mxu0 %v2341_v1 }
 0x153   : > { %2099 = vmatpush3.bf16.xpose.msra.mxu1 %v1523_v49  ;;  %2102 = vmatprep.mubr.msk.bf16.mxu1 %vm2342_vm0, %v2341_v1 }
 0x154   : > { %2100 = vmatprep.subr.bf16.mxu1 %v2341_v1 }
 0x159   : > { %2093 = vmatpush3.bf16.xpose.msra.mxu0 %v1457_v4 }
 0x15a   : > { %2106 = vmatprep.subr.bf16.mxu0 %v2341_v1 }
 0x15b   : > { %2101 = vmatpush3.bf16.xpose.msra.mxu1 %v1522_v39 }
 0x15c   : > { %2114 = vmatprep.subr.bf16.mxu1 %v2341_v1 }
 0x160   : > { %2095 = vmatmul.mubr.bf16.vlgmr.msra.gmra.mxu0 %v2672_v47 }
 0x161   : > { %2107 = vmatpush3.bf16.xpose.msra.mxu0 %v1588_v44  ;;  %2110 = vmatprep.mubr.msk.bf16.mxu0 %vm2342_vm0, %v2341_v1 }
 0x162   : > { %2103 = vmatmul.mubr.bf16.vlgmr.msra.gmra.mxu1 %v2672_v47  ;;  %2108 = vmatprep.subr.bf16.mxu0 %v2341_v1 }
 0x163   : > { %2115 = vmatpush3.bf16.xpose.msra.mxu1 %v1653_v50  ;;  %2118 = vmatprep.mubr.msk.bf16.mxu1 %vm2342_vm0, %v2341_v1 }
 0x164   : > { %2116 = vmatprep.subr.bf16.mxu1 %v2341_v1  ;;  %v2913_v1 = vpop.permute.xlu0 %678 }
 0x165   : > { %v749_v15 = vmul.f32 %v1875_v56, %v2913_v1  ;;  %v814_v62 = vmul.f32 %v1878_v61, %v2913_v1  ;;  %v879_v27 = vmul.f32 %v1881_v40, %v2913_v1  ;;  %v944_v35 = vmul.f32 %v1884_v12, %v2913_v1 }
 0x166   : > { %v1009_v20 = vmul.f32 %v1887_v9, %v2913_v1  ;;  %v1074_v46 = vmul.f32 %v1890_v33, %v2913_v1  ;;  %v1139_v50 = vmul.f32 %v1893_v48, %v2913_v1 }
 0x169   : > { %2109 = vmatpush3.bf16.xpose.msra.mxu0 %v1587_v53 }
 0x16b   : > { %2117 = vmatpush3.bf16.xpose.msra.mxu1 %v1652_v54  ;;  %v1894_v54 = vld [vmem:[%s2920_s13 + $0x1c] sm:$0xf] }
 0x170   : > { %2111 = vmatmul.mubr.bf16.vlgmr.msra.gmra.mxu0 %v2672_v47 }
 0x172   : > { %2119 = vmatmul.mubr.bf16.vlgmr.msra.gmra.mxu1 %v2672_v47  ;;  %v685_v47 = vmul.f32 %v1874_v14, %v2913_v1 }
 0x1c0   : > { %v720_v16 = vpop.f32.mrf.mxu0 }
 0x1c1   : > { %v721_v18 = vadd.f32 %v720_v16, %v685_v47 }
 0x1c2   : > { %v784_v19 = vpop.f32.mrf.mxu1  ;;  %v2000_v23 = vpop.f32.mrf.mxu0 }
 0x1c3   : > { %v727_v58 = vadd.f32 %v726_v17, %v721_v18  ;;  %v785_v24 = vadd.f32 %v784_v19, %v749_v15  ;;  %v1896_v23 = vld [vmem:[%s2911_s28 + $0x8] ss:$0 sm:$0xff] }
 0x1c4   : > { %v2008_v60 = vpop.f32.mrf.mxu1  ;;  %v723_v26 = vpop.f32.mrf.mxu0 }
 0x1c5   : > { %729 = vst.msk [vmem:[%s2928_s12] sm:$0xf] %vm728_vm2, %v727_v58  ;;  %v792_v30 = vadd.f32 %v1876_v22, %v785_v24  ;;  %v1899_v58 = vld [vmem:[%s2911_s28 + $0x9] ss:$0 sm:$0xff]  ;;  %v1204_v24 = vmul.f32 %v1896_v23, %v2913_v1 }
 0x1c6   : > { %v787_v31 = vpop.f32.mrf.mxu1  ;;  %v2001_v37 = vpop.f32.mrf.mxu0  ;;  %v1269_v60 = vmul.f32 %v1899_v58, %v2913_v1 }
 0x1c7   : > { %1877 = vst.msk [vmem:[%s2928_s12 + $0x4] sm:$0xf] %vm728_vm2, %v792_v30  ;;  %v1897_v30 = vld [vmem:[%s2920_s13 + $0x20] sm:$0xf] }
 0x1c8   : > { %v2009_v38 = vpop.f32.mrf.mxu1 }
 0x1c9   : > { %v1900_v38 = vld [vmem:[%s2920_s13 + $0x24] sm:$0xf] }
 0x1d0   : > { %v849_v0 = vpop.f32.mrf.mxu0 }
 0x1d1   : > { %v850_v51 = vadd.f32 %v849_v0, %v814_v62 }
 0x1d2   : > { %v914_v5 = vpop.f32.mrf.mxu1  ;;  %v2016_v6 = vpop.f32.mrf.mxu0 }
 0x1d3   : > { %v857_v45 = vadd.f32 %v1879_v2, %v850_v51  ;;  %v915_v52 = vadd.f32 %v914_v5, %v879_v27  ;;  %v1902_v6 = vld [vmem:[%s2911_s28 + $0xa] ss:$0 sm:$0xff] }
 0x1d4   : > { %v2024_v3 = vpop.f32.mrf.mxu1  ;;  %v852_v34 = vpop.f32.mrf.mxu0 }
 0x1d5   : > { %1880 = vst.msk [vmem:[%s2928_s12 + $0x8] sm:$0xf] %vm728_vm2, %v857_v45  ;;  %v922_v55 = vadd.f32 %v1882_v42, %v915_v52  ;;  %v1905_v45 = vld [vmem:[%s2911_s28 + $0xb] ss:$0 sm:$0xff]  ;;  %v1334_v52 = vmul.f32 %v1902_v6, %v2913_v1 }
 0x1d6   : > { %v917_v28 = vpop.f32.mrf.mxu1  ;;  %v2017_v57 = vpop.f32.mrf.mxu0  ;;  %v1399_v3 = vmul.f32 %v1905_v45, %v2913_v1 }
 0x1d7   : > { %1883 = vst.msk [vmem:[%s2928_s12 + $0xc] sm:$0xf] %vm728_vm2, %v922_v55  ;;  %v1903_v55 = vld [vmem:[%s2920_s13 + $0x28] sm:$0xf] }
 0x1d8   : > { %v2025_v8 = vpop.f32.mrf.mxu1 }
 0x1d9   : > { %v1906_v8 = vld [vmem:[%s2920_s13 + $0x2c] sm:$0xf] }
 0x1e0   : > { %v979_v59 = vpop.f32.mrf.mxu0 }
 0x1e1   : > { %v980_v63 = vadd.f32 %v979_v59, %v944_v35 }
 0x1e2   : > { %v1044_v49 = vpop.f32.mrf.mxu1  ;;  %v2032_v7 = vpop.f32.mrf.mxu0 }
 0x1e3   : > { %v987_v4 = vadd.f32 %v1885_v25, %v980_v63  ;;  %v1045_v32 = vadd.f32 %v1044_v49, %v1009_v20  ;;  %v1908_v7 = vld [vmem:[%s2911_s28 + $0xc] ss:$0 sm:$0xff] }
 0x1e4   : > { %v2040_v36 = vpop.f32.mrf.mxu1  ;;  %v982_v39 = vpop.f32.mrf.mxu0 }
 0x1e5   : > { %1886 = vst.msk [vmem:[%s2928_s12 + $0x10] sm:$0xf] %vm728_vm2, %v987_v4  ;;  %v1052_v41 = vadd.f32 %v1888_v21, %v1045_v32  ;;  %v1911_v4 = vld [vmem:[%s2911_s28 + $0xd] ss:$0 sm:$0xff]  ;;  %v1464_v32 = vmul.f32 %v1908_v7, %v2913_v1 }
 0x1e6   : > { %v1047_v29 = vpop.f32.mrf.mxu1  ;;  %v2033_v43 = vpop.f32.mrf.mxu0  ;;  %v1529_v36 = vmul.f32 %v1911_v4, %v2913_v1 }
 0x1e7   : > { %1889 = vst.msk [vmem:[%s2928_s12 + $0x14] sm:$0xf] %vm728_vm2, %v1052_v41  ;;  %v1909_v41 = vld [vmem:[%s2920_s13 + $0x30] sm:$0xf] }
 0x1e8   : > { %v2041_v44 = vpop.f32.mrf.mxu1 }
 0x1e9   : > { %v1912_v44 = vld [vmem:[%s2920_s13 + $0x34] sm:$0xf] }
 0x1f0   : > { %v1109_v10 = vpop.f32.mrf.mxu0 }
 0x1f1   : > { %v1110_v53 = vadd.f32 %v1109_v10, %v1074_v46 }
 0x1f2   : > { %v1174_v13 = vpop.f32.mrf.mxu1  ;;  %v2048_v14 = vpop.f32.mrf.mxu0 }
 0x1f3   : > { %v1117_v56 = vadd.f32 %v1891_v11, %v1110_v53  ;;  %v1175_v47 = vadd.f32 %v1174_v13, %v1139_v50  ;;  %v1914_v14 = vld [vmem:[%s2911_s28 + $0xe] ss:$0 sm:$0xff] }
 0x1f4   : > { %v2056_v15 = vpop.f32.mrf.mxu1  ;;  %v1112_v16 = vpop.f32.mrf.mxu0 }
 0x1f5   : > { %1892 = vst.msk [vmem:[%s2928_s12 + $0x18] sm:$0xf] %vm728_vm2, %v1117_v56  ;;  %v1182_v17 = vadd.f32 %v1894_v54, %v1175_v47  ;;  %v1917_v56 = vld [vmem:[%s2911_s28 + $0xf] ss:$0 sm:$0xff]  ;;  %v1594_v47 = vmul.f32 %v1914_v14, %v2913_v1 }
 0x1f6   : > { %v1177_v18 = vpop.f32.mrf.mxu1  ;;  %v2049_v19 = vpop.f32.mrf.mxu0  ;;  %v1659_v15 = vmul.f32 %v1917_v56, %v2913_v1 }
 0x1f7   : > { %1895 = vst.msk [vmem:[%s2928_s12 + $0x1c] sm:$0xf] %vm728_vm2, %v1182_v17  ;;  %v1915_v17 = vld [vmem:[%s2920_s13 + $0x38] sm:$0xf] }
 0x1f8   : > { %v2057_v22 = vpop.f32.mrf.mxu1 }
 0x1f9   : > { %v1918_v22 = vld [vmem:[%s2920_s13 + $0x3c] sm:$0xf] }
 0x200   : > { %v1239_v26 = vpop.f32.mrf.mxu0 }
 0x201   : > { %v1240_v31 = vadd.f32 %v1239_v26, %v1204_v24 }
 0x202   : > { %v1304_v37 = vpop.f32.mrf.mxu1  ;;  %v2064_v61 = vpop.f32.mrf.mxu0 }
 0x203   : > { %v1247_v40 = vadd.f32 %v1897_v30, %v1240_v31  ;;  %v1305_v62 = vadd.f32 %v1304_v37, %v1269_v60 }
 0x204   : > { %v2072_v27 = vpop.f32.mrf.mxu1  ;;  %v1242_v0 = vpop.f32.mrf.mxu0 }
 0x205   : > { %1898 = vst.msk [vmem:[%s2928_s12 + $0x20] sm:$0xf] %vm728_vm2, %v1247_v40  ;;  %v1312_v2 = vadd.f32 %v1900_v38, %v1305_v62 }
 0x206   : > { %v1307_v51 = vpop.f32.mrf.mxu1  ;;  %v2065_v5 = vpop.f32.mrf.mxu0 }
 0x207   : > { %1901 = vst.msk [vmem:[%s2928_s12 + $0x24] sm:$0xf] %vm728_vm2, %v1312_v2 }
 0x208   : > { %v2073_v42 = vpop.f32.mrf.mxu1 }
 0x210   : > { %v1369_v34 = vpop.f32.mrf.mxu0 }
 0x211   : > { %v1370_v28 = vadd.f32 %v1369_v34, %v1334_v52 }
 0x212   : > { %v1434_v57 = vpop.f32.mrf.mxu1  ;;  %v2080_v12 = vpop.f32.mrf.mxu0 }
 0x213   : > { %v1377_v9 = vadd.f32 %v1903_v55, %v1370_v28  ;;  %v1435_v35 = vadd.f32 %v1434_v57, %v1399_v3 }
 0x214   : > { %v2088_v20 = vpop.f32.mrf.mxu1  ;;  %v1372_v59 = vpop.f32.mrf.mxu0 }
 0x215   : > { %1904 = vst.msk [vmem:[%s2928_s12 + $0x28] sm:$0xf] %vm728_vm2, %v1377_v9  ;;  %v1442_v25 = vadd.f32 %v1906_v8, %v1435_v35 }
 0x216   : > { %v1437_v63 = vpop.f32.mrf.mxu1  ;;  %v2081_v49 = vpop.f32.mrf.mxu0 }
 0x217   : > { %1907 = vst.msk [vmem:[%s2928_s12 + $0x2c] sm:$0xf] %vm728_vm2, %v1442_v25 }
 0x218   : > { %v2089_v21 = vpop.f32.mrf.mxu1 }
 0x220   : > { %v1499_v39 = vpop.f32.mrf.mxu0 }
 0x221   : > { %v1500_v29 = vadd.f32 %v1499_v39, %v1464_v32 }
 0x222   : > { %v1564_v43 = vpop.f32.mrf.mxu1  ;;  %v2096_v33 = vpop.f32.mrf.mxu0 }
 0x223   : > { %v1507_v48 = vadd.f32 %v1909_v41, %v1500_v29  ;;  %v1565_v46 = vadd.f32 %v1564_v43, %v1529_v36 }
 0x224   : > { %v2104_v50 = vpop.f32.mrf.mxu1  ;;  %v1502_v10 = vpop.f32.mrf.mxu0 }
 0x225   : > { %1910 = vst.msk [vmem:[%s2928_s12 + $0x30] sm:$0xf] %vm728_vm2, %v1507_v48  ;;  %v1572_v11 = vadd.f32 %v1912_v44, %v1565_v46 }
 0x226   : > { %v1567_v53 = vpop.f32.mrf.mxu1  ;;  %v2097_v13 = vpop.f32.mrf.mxu0 }
 0x227   : > { %1913 = vst.msk [vmem:[%s2928_s12 + $0x34] sm:$0xf] %vm728_vm2, %v1572_v11 }
 0x228   : > { %v2105_v54 = vpop.f32.mrf.mxu1 }
 0x230   : > { %v1629_v16 = vpop.f32.mrf.mxu0 }
 0x231   : > { %v1630_v18 = vadd.f32 %v1629_v16, %v1594_v47 }
 0x232   : > { %v1694_v19 = vpop.f32.mrf.mxu1  ;;  %v2112_v23 = vpop.f32.mrf.mxu0 }
 0x233   : > { %v1637_v58 = vadd.f32 %v1915_v17, %v1630_v18  ;;  %v1695_v24 = vadd.f32 %v1694_v19, %v1659_v15 }
 0x234   : > { %v2120_v60 = vpop.f32.mrf.mxu1  ;;  %v1632_v26 = vpop.f32.mrf.mxu0 }
 0x235   : > { %1916 = vst.msk [vmem:[%s2928_s12 + $0x38] sm:$0xf] %vm728_vm2, %v1637_v58  ;;  %v1702_v30 = vadd.f32 %v1918_v22, %v1695_v24 }
 0x236   : > { %v1697_v31 = vpop.f32.mrf.mxu1  ;;  %v2113_v37 = vpop.f32.mrf.mxu0 }
 0x237   : > { %1919 = vst.msk [vmem:[%s2928_s12 + $0x3c] sm:$0xf] %vm728_vm2, %v1702_v30 }
 0x238   : > { %v2121_v38 = vpop.f32.mrf.mxu1 }
 0x239 PF: > { %s20_s17 = sadd.s32 1, %s2339_s17   ;;  %s3031_s13 = smov %s2331_s15 }
 0x23a   : > { %p17_p8 = scmp.ge.s32.totalorder %s20_s17, 6   ;;  %s3032_s14 = smov %s2335_s16 }
 0x23b   : > { %s3033_s15 = smov %s3036_s18  ;;  %s3034_s16 = smov %s3040_s19 }
 0x23c   :  { %19 = sbr.rel (!%p17_p8) target bundleno = 3 (0x3), region = 129 }

</bundles_post_ra>
